<compile_context>
chip_gen: v6e
topology: v6e:2x2x1
jax: 0.10.0
libtpu: 0.0.40
codegen_flags: <defaults>
</compile_context>

<pallas_src>
import functools
import math

import jax
import jax.numpy as jnp
import numpy as np
from jax.experimental import pallas as pl
from jax.experimental.pallas import tpu as pltpu

NUM_HEADS = 4
EPS = 1e-6


def _layernorm(v, g, b):
    mu = jnp.mean(v, axis=-1, keepdims=True)
    var = jnp.mean((v - mu) ** 2, axis=-1, keepdims=True)
    return (v - mu) * jax.lax.rsqrt(var + EPS) * g + b


def block_kernel(
    x_ref,
    wqkv_ref, bqkv_ref, wo_ref, bo_ref,
    g1_ref, be1_ref, g2_ref, be2_ref,
    w1_ref, b1_ref, w2_ref, b2_ref,
    gf2_ref, bf2_ref,
    o_ref,
    *, num_heads, recycles,
):
    BT, S, D = x_ref.shape
    H = num_heads
    hd = D // H
    N = BT * S

    x0 = x_ref[...].astype(jnp.float32).reshape(N, D)

    def body(_, x):
        # ---- self-attention sublayer (pre-LN + residual) ----
        xn = _layernorm(x, g1_ref[...], be1_ref[...])
        # Fused QKV: one full-width (N,D)x(D,3D) MXU matmul; 1/sqrt(hd) is
        # pre-folded into the Q columns of wqkv / bqkv.
        qkv = jnp.dot(xn.astype(jnp.bfloat16), wqkv_ref[...],
                      preferred_element_type=jnp.float32) + bqkv_ref[...]   # (N,3D)
        qkv = qkv.reshape(BT, S, 3 * D)

        # TODO(synk): for long sequences, tile flash-style over KV (and the FFN
        # over F) instead of materializing full (S,S) scores per head — needed
        # to fit v7x's 64 MiB VMEM at realistic D/F/S.
        heads = []
        for h in range(H):                       # static, small; per-(b,h) attention
            q_h = qkv[:, :, h * hd:(h + 1) * hd].astype(jnp.bfloat16)
            k_h = qkv[:, :, D + h * hd:D + (h + 1) * hd].astype(jnp.bfloat16)
            v_h = qkv[:, :, 2 * D + h * hd:2 * D + (h + 1) * hd].astype(jnp.bfloat16)
            s = jnp.einsum("bqe,bke->bqk", q_h, k_h,
                           preferred_element_type=jnp.float32)              # (BT,S,S)
            s = s - jnp.max(s, axis=-1, keepdims=True)
            # TODO(synk): on v6e/v7x a bf16 exp here (~2x EUP throughput) is
            # safe post-max-subtract; kept f32 for a tight numerical check.
            p = jnp.exp(s)
            p = p * pl.reciprocal(jnp.sum(p, axis=-1, keepdims=True))       # exact
            heads.append(jnp.einsum("bqk,bke->bqe", p.astype(jnp.bfloat16), v_h,
                                    preferred_element_type=jnp.float32))

        o = jnp.concatenate(heads, axis=-1).reshape(N, D)                   # (N,D)
        # Fused output projection: single K=D contraction against original wo.
        attn = jnp.dot(o.astype(jnp.bfloat16), wo_ref[...],
                       preferred_element_type=jnp.float32) + bo_ref[...]
        x = x + attn

        # ---- feed-forward sublayer (pre-LN + residual) ----
        xn2 = _layernorm(x, g2_ref[...], be2_ref[...])
        h1 = jnp.dot(xn2.astype(jnp.bfloat16), w1_ref[...],
                     preferred_element_type=jnp.float32) + b1_ref[...]
        h1 = jnp.maximum(h1, 0.0)
        ff = jnp.dot(h1.astype(jnp.bfloat16), w2_ref[...],
                     preferred_element_type=jnp.float32) + b2_ref[...]
        x = x + ff

        # ---- BlocksRecycling epilogue: x = norm(x); x += x  (doubling folded
        #      into gf2 = 2*gf, bf2 = 2*bf) ----
        return _layernorm(x, gf2_ref[...], bf2_ref[...])

    x = jax.lax.fori_loop(0, recycles, body, x0, unroll=True)

    # TODO(synk): D < 128 produces masked (sub-lane) output stores; if such
    # small hidden sizes are real, fold S into the lane dim at the wrapper.
    o_ref[...] = x.reshape(BT, S, D).astype(o_ref.dtype)


def _vmem_capacity_bytes():
    try:
        return int(pltpu.get_tpu_info().vmem_capacity_bytes)
    except Exception:
        return 64 << 20   # conservative fallback (v7x per-TC physical VMEM)


def _act_bytes(bt, S, D, F, H, x_itemsize):
    return (
        4 * bt * S * (12 * D + 3 * F)      # f32 + bf16 activation working set
        + 8 * bt * H * S * S               # per-head scores + probs (conservative)
        + 4 * bt * S * D * x_itemsize      # double-buffered input and output x blocks
    )


def _pick_bt(B, S, D, F, H, budget, x_itemsize):
    """Largest BT dividing B s.t. >=2 parallel grid steps remain and acts fit."""
    bt = 1
    for cand in range(1, B + 1):
        if B % cand:
            continue
        if B >= 2 and B // cand < 2:
            break   # keep both v7x TensorCores busy
        if _act_bytes(cand, S, D, F, H, x_itemsize) <= budget // 4:
            bt = cand
    return bt
    # TODO(synk): when B == 1, add a parallel query-tile axis over S instead.


@functools.partial(jax.jit, static_argnames=("recycles",))
def blocks_recycling(x, params, recycles):
    B, S, D = x.shape
    H = NUM_HEADS
    assert D % H == 0, "hidden size must be divisible by NUM_HEADS"
    hd = D // H
    F = params["w1"].shape[-1]
    scale = 1.0 / math.sqrt(hd)

    # ---- trace-time weight prep: fused QKV, folded constants, bf16 MXU operands ----
    wqkv = jnp.concatenate(
        [params["wq"] * scale, params["wk"], params["wv"]], axis=1
    ).astype(jnp.bfloat16)                                               # (D, 3D)
    bqkv = jnp.concatenate(
        [params["bq"] * scale, params["bk"], params["bv"]], axis=1
    ).astype(jnp.float32)                                                # (1, 3D)
    wo = params["wo"].astype(jnp.bfloat16)                               # (D, D)
    w1 = params["w1"].astype(jnp.bfloat16)                               # (D, F)
    w2 = params["w2"].astype(jnp.bfloat16)                               # (F, D)
    gf2 = 2.0 * params["gf"]                                             # x += x folded
    bf2 = 2.0 * params["bf"]

    weights = (
        wqkv, bqkv, wo, params["bo"],
        params["g1"], params["be1"], params["g2"], params["be2"],
        w1, params["b1"], w2, params["b2"],
        gf2, bf2,
    )

    # ---- generation-aware VMEM budgeting ----
    vmem_cap = (7 * _vmem_capacity_bytes()) // 8         # ~87.5% of physical
    BT = _pick_bt(B, S, D, F, H, vmem_cap, x.dtype.itemsize)
    weight_bytes = sum(int(np.prod(w.shape)) * w.dtype.itemsize for w in weights)
    act_bytes = _act_bytes(BT, S, D, F, H, x.dtype.itemsize)
    vmem_limit = int(min(vmem_cap,
                         max(32 << 20, weight_bytes + act_bytes + (4 << 20))))

    # Grid-invariant weights: whole-array resident in VMEM, single buffer.
    vmem_weight_spec = pl.BlockSpec(memory_space=pltpu.MemorySpace.VMEM)
    in_specs = [pl.BlockSpec((BT, S, D), lambda b: (b, 0, 0))]
    in_specs += [vmem_weight_spec] * len(weights)

    kernel = functools.partial(block_kernel, num_heads=H, recycles=recycles)

    return pl.pallas_call(
        kernel,
        grid=(B // BT,),
        in_specs=in_specs,
        out_specs=pl.BlockSpec((BT, S, D), lambda b: (b, 0, 0)),
        out_shape=jax.ShapeDtypeStruct((B, S, D), x.dtype),
        compiler_params=pltpu.CompilerParams(
            dimension_semantics=("parallel",),   # batch axis feeds both v7x TCs
            vmem_limit_bytes=vmem_limit,
        ),
    )(x, *weights)


def make_params(key, D, F):
    ks = jax.random.split(key, 8)
    n = lambda k, shape, s=0.1: (s * jax.random.normal(k, shape)).astype(jnp.float32)
    return {
        "wq": n(ks[0], (D, D)), "wk": n(ks[1], (D, D)),
        "wv": n(ks[2], (D, D)), "wo": n(ks[3], (D, D)),
        "bq": jnp.zeros((1, D), jnp.float32), "bk": jnp.zeros((1, D), jnp.float32),
        "bv": jnp.zeros((1, D), jnp.float32), "bo": jnp.zeros((1, D), jnp.float32),
        "g1": jnp.ones((1, D), jnp.float32), "be1": jnp.zeros((1, D), jnp.float32),
        "g2": jnp.ones((1, D), jnp.float32), "be2": jnp.zeros((1, D), jnp.float32),
        "w1": n(ks[4], (D, F)), "b1": jnp.zeros((1, F), jnp.float32),
        "w2": n(ks[5], (F, D)), "b2": jnp.zeros((1, D), jnp.float32),
        "gf": jnp.ones((1, D), jnp.float32), "bf": jnp.zeros((1, D), jnp.float32),
    }


def reference(x, p, recycles):
    """Pure-JAX f32 reference (module semantics) for a numerical sanity check."""
    D = x.shape[-1]
    hd = D // NUM_HEADS
    for _ in range(recycles):
        xn = _layernorm(x, p["g1"], p["be1"])
        q = xn @ p["wq"] + p["bq"]
        k = xn @ p["wk"] + p["bk"]
        v = xn @ p["wv"] + p["bv"]
        outs = []
        for h in range(NUM_HEADS):
            sl = slice(h * hd, (h + 1) * hd)
            s = jnp.einsum("bqd,bkd->bqk", q[..., sl], k[..., sl]) / math.sqrt(hd)
            outs.append(jnp.einsum("bqk,bkd->bqd", jax.nn.softmax(s, axis=-1), v[..., sl]))
        x = x + jnp.concatenate(outs, axis=-1) @ p["wo"] + p["bo"]
        xn2 = _layernorm(x, p["g2"], p["be2"])
        x = x + jnp.maximum(xn2 @ p["w1"] + p["b1"], 0.0) @ p["w2"] + p["b2"]
        x = _layernorm(x, p["gf"], p["bf"])
        x = x + x
    return x


if __name__ == "__main__":
    B, S, D, F, RECYCLES = 2, 8, 32, 64, 2
    key = jax.random.PRNGKey(0)
    kx, kp = jax.random.split(key)
    x = jax.random.normal(kx, (B, S, D), dtype=jnp.float32)
    params = make_params(kp, D, F)

    out = blocks_recycling(x, params, RECYCLES)
    out = jax.block_until_ready(out)

    ref = reference(x, params, RECYCLES)
    # Tolerance accounts only for bf16 MXU operands (f32 accumulation, f32
    # LN/softmax, exact reciprocal) across `recycles` iterations.
    np.testing.assert_allclose(np.asarray(out), np.asarray(ref), atol=5e-2, rtol=5e-2)
    print("KERNEL_OK")
</pallas_src>

<mosaic_0001>
module attributes {stable_mosaic.version = 11 : i64} {
  func.func @block_kernel(%arg0: i32, %arg1: memref<1x8x32xf32, #tpu.memory_space<vmem>>, %arg2: memref<32x96xbf16, #tpu.memory_space<vmem>>, %arg3: memref<1x96xf32, #tpu.memory_space<vmem>>, %arg4: memref<32x32xbf16, #tpu.memory_space<vmem>>, %arg5: memref<1x32xf32, #tpu.memory_space<vmem>>, %arg6: memref<1x32xf32, #tpu.memory_space<vmem>>, %arg7: memref<1x32xf32, #tpu.memory_space<vmem>>, %arg8: memref<1x32xf32, #tpu.memory_space<vmem>>, %arg9: memref<1x32xf32, #tpu.memory_space<vmem>>, %arg10: memref<32x64xbf16, #tpu.memory_space<vmem>>, %arg11: memref<1x64xf32, #tpu.memory_space<vmem>>, %arg12: memref<64x32xbf16, #tpu.memory_space<vmem>>, %arg13: memref<1x32xf32, #tpu.memory_space<vmem>>, %arg14: memref<1x32xf32, #tpu.memory_space<vmem>>, %arg15: memref<1x32xf32, #tpu.memory_space<vmem>>, %arg16: memref<1x8x32xf32, #tpu.memory_space<vmem>>) attributes {dimension_semantics = [#tpu.dimension_semantics<parallel>], iteration_bounds = array<i64: 2>, scalar_prefetch = 0 : i64, scratch_operands = 0 : i64, tpu.core_type = #tpu.core_type<tc>, window_params = [{transform_indices = @transform_0, window_bounds = array<i64: 1, 8, 32>}, {pipeline_mode = #tpu.pipeline_mode<synchronous>, transform_indices = @transform_1, window_bounds = array<i64: 32, 96>}, {pipeline_mode = #tpu.pipeline_mode<synchronous>, transform_indices = @transform_2, window_bounds = array<i64: 1, 96>}, {pipeline_mode = #tpu.pipeline_mode<synchronous>, transform_indices = @transform_3, window_bounds = array<i64: 32, 32>}, {pipeline_mode = #tpu.pipeline_mode<synchronous>, transform_indices = @transform_4, window_bounds = array<i64: 1, 32>}, {pipeline_mode = #tpu.pipeline_mode<synchronous>, transform_indices = @transform_5, window_bounds = array<i64: 1, 32>}, {pipeline_mode = #tpu.pipeline_mode<synchronous>, transform_indices = @transform_6, window_bounds = array<i64: 1, 32>}, {pipeline_mode = #tpu.pipeline_mode<synchronous>, transform_indices = @transform_7, window_bounds = array<i64: 1, 32>}, {pipeline_mode = #tpu.pipeline_mode<synchronous>, transform_indices = @transform_8, window_bounds = array<i64: 1, 32>}, {pipeline_mode = #tpu.pipeline_mode<synchronous>, transform_indices = @transform_9, window_bounds = array<i64: 32, 64>}, {pipeline_mode = #tpu.pipeline_mode<synchronous>, transform_indices = @transform_10, window_bounds = array<i64: 1, 64>}, {pipeline_mode = #tpu.pipeline_mode<synchronous>, transform_indices = @transform_11, window_bounds = array<i64: 64, 32>}, {pipeline_mode = #tpu.pipeline_mode<synchronous>, transform_indices = @transform_12, window_bounds = array<i64: 1, 32>}, {pipeline_mode = #tpu.pipeline_mode<synchronous>, transform_indices = @transform_13, window_bounds = array<i64: 1, 32>}, {pipeline_mode = #tpu.pipeline_mode<synchronous>, transform_indices = @transform_14, window_bounds = array<i64: 1, 32>}, {transform_indices = @transform_15, window_bounds = array<i64: 1, 8, 32>}]} {
    %c0 = arith.constant 0 : index
    %c0_0 = arith.constant 0 : index
    %c0_1 = arith.constant 0 : index
    %0 = vector.load %arg1[%c0, %c0_0, %c0_1] : memref<1x8x32xf32, #tpu.memory_space<vmem>>, vector<1x8x32xf32>
    %1 = vector.shape_cast %0 : vector<1x8x32xf32> to vector<8x32xf32>
    %c0_i32 = arith.constant 0 : i32
    %c0_2 = arith.constant 0 : index
    %c0_3 = arith.constant 0 : index
    %2 = vector.load %arg6[%c0_2, %c0_3] : memref<1x32xf32, #tpu.memory_space<vmem>>, vector<1x32xf32>
    %c0_4 = arith.constant 0 : index
    %c0_5 = arith.constant 0 : index
    %3 = vector.load %arg7[%c0_4, %c0_5] : memref<1x32xf32, #tpu.memory_space<vmem>>, vector<1x32xf32>
    %cst = arith.constant dense<0.000000e+00> : vector<8xf32>
    %4 = vector.multi_reduction <add>, %1, %cst [1] : vector<8x32xf32> to vector<8xf32>
    %5 = vector.shape_cast %4 : vector<8xf32> to vector<8x1xf32>
    %cst_6 = arith.constant 3.200000e+01 : f32
    %6 = vector.broadcast %cst_6 : f32 to vector<8x1xf32>
    %7 = arith.divf %5, %6 : vector<8x1xf32>
    %8 = vector.broadcast %7 : vector<8x1xf32> to vector<8x32xf32>
    %9 = arith.subf %1, %8 : vector<8x32xf32>
    %10 = arith.mulf %9, %9 : vector<8x32xf32>
    %cst_7 = arith.constant dense<0.000000e+00> : vector<8xf32>
    %11 = vector.multi_reduction <add>, %10, %cst_7 [1] : vector<8x32xf32> to vector<8xf32>
    %12 = vector.shape_cast %11 : vector<8xf32> to vector<8x1xf32>
    %cst_8 = arith.constant 3.200000e+01 : f32
    %13 = vector.broadcast %cst_8 : f32 to vector<8x1xf32>
    %14 = arith.divf %12, %13 : vector<8x1xf32>
    %15 = vector.broadcast %7 : vector<8x1xf32> to vector<8x32xf32>
    %16 = arith.subf %1, %15 : vector<8x32xf32>
    %cst_9 = arith.constant 9.99999997E-7 : f32
    %17 = vector.broadcast %cst_9 : f32 to vector<8x1xf32>
    %18 = arith.addf %14, %17 : vector<8x1xf32>
    %19 = math.rsqrt %18 : vector<8x1xf32>
    %20 = vector.broadcast %19 : vector<8x1xf32> to vector<8x32xf32>
    %21 = arith.mulf %16, %20 : vector<8x32xf32>
    %22 = vector.broadcast %2 : vector<1x32xf32> to vector<8x32xf32>
    %23 = arith.mulf %21, %22 : vector<8x32xf32>
    %24 = vector.broadcast %3 : vector<1x32xf32> to vector<8x32xf32>
    %25 = arith.addf %23, %24 : vector<8x32xf32>
    %26 = arith.truncf %25 : vector<8x32xf32> to vector<8x32xbf16>
    %c0_10 = arith.constant 0 : index
    %c0_11 = arith.constant 0 : index
    %27 = vector.load %arg2[%c0_10, %c0_11] : memref<32x96xbf16, #tpu.memory_space<vmem>>, vector<32x96xbf16>
    %cst_12 = arith.constant dense<0.000000e+00> : vector<8x96xf32>
    %28 = tpu.matmul %26, %27, %cst_12 {dimension_numbers = #tpu.dot_dimension_numbers<[1], [0], [0], [1], [0, 0, 1, 1], [], []>} : vector<8x32xbf16>, vector<32x96xbf16>, vector<8x96xf32> -> vector<8x96xf32>
    %c0_13 = arith.constant 0 : index
    %c0_14 = arith.constant 0 : index
    %29 = vector.load %arg3[%c0_13, %c0_14] : memref<1x96xf32, #tpu.memory_space<vmem>>, vector<1x96xf32>
    %30 = vector.broadcast %29 : vector<1x96xf32> to vector<8x96xf32>
    %31 = arith.addf %28, %30 : vector<8x96xf32>
    %32 = vector.shape_cast %31 : vector<8x96xf32> to vector<1x8x96xf32>
    %33 = vector.extract_strided_slice %32 {offsets = [0, 0, 0], sizes = [1, 8, 8], strides = [1, 1, 1]} : vector<1x8x96xf32> to vector<1x8x8xf32>
    %34 = arith.truncf %33 : vector<1x8x8xf32> to vector<1x8x8xbf16>
    %35 = vector.extract_strided_slice %32 {offsets = [0, 0, 32], sizes = [1, 8, 8], strides = [1, 1, 1]} : vector<1x8x96xf32> to vector<1x8x8xf32>
    %36 = arith.truncf %35 : vector<1x8x8xf32> to vector<1x8x8xbf16>
    %37 = vector.extract_strided_slice %32 {offsets = [0, 0, 64], sizes = [1, 8, 8], strides = [1, 1, 1]} : vector<1x8x96xf32> to vector<1x8x8xf32>
    %38 = arith.truncf %37 : vector<1x8x8xf32> to vector<1x8x8xbf16>
    "tpu.trace_start"() <{level = 10 : i32, message = "bqe,bke->bqk"}> : () -> ()
    %cst_15 = arith.constant dense<0.000000e+00> : vector<1x8x8xf32>
    %39 = tpu.matmul %34, %36, %cst_15 {dimension_numbers = #tpu.dot_dimension_numbers<[2], [2], [1], [1], [0, 0, 0, 1, 1, 1], [0], [0]>} : vector<1x8x8xbf16>, vector<1x8x8xbf16>, vector<1x8x8xf32> -> vector<1x8x8xf32>
    "tpu.trace_stop"() : () -> ()
    %cst_16 = arith.constant dense<0xFF800000> : vector<1x8xf32>
    %40 = vector.multi_reduction <maximumf>, %39, %cst_16 [2] : vector<1x8x8xf32> to vector<1x8xf32>
    %41 = vector.shape_cast %40 : vector<1x8xf32> to vector<1x8x1xf32>
    %42 = vector.broadcast %41 : vector<1x8x1xf32> to vector<1x8x8xf32>
    %43 = arith.subf %39, %42 : vector<1x8x8xf32>
    %44 = math.exp %43 : vector<1x8x8xf32>
    %cst_17 = arith.constant dense<0.000000e+00> : vector<1x8xf32>
    %45 = vector.multi_reduction <add>, %44, %cst_17 [2] : vector<1x8x8xf32> to vector<1x8xf32>
    %46 = vector.shape_cast %45 : vector<1x8xf32> to vector<1x8x1xf32>
    %47 = tpu.reciprocal %46 : vector<1x8x1xf32> -> vector<1x8x1xf32>
    %48 = vector.broadcast %47 : vector<1x8x1xf32> to vector<1x8x8xf32>
    %49 = arith.mulf %44, %48 : vector<1x8x8xf32>
    %50 = arith.truncf %49 : vector<1x8x8xf32> to vector<1x8x8xbf16>
    "tpu.trace_start"() <{level = 10 : i32, message = "bqk,bke->bqe"}> : () -> ()
    %cst_18 = arith.constant dense<0.000000e+00> : vector<1x8x8xf32>
    %51 = tpu.matmul %50, %38, %cst_18 {dimension_numbers = #tpu.dot_dimension_numbers<[2], [1], [1], [2], [0, 0, 0, 1, 1, 2], [0], [0]>} : vector<1x8x8xbf16>, vector<1x8x8xbf16>, vector<1x8x8xf32> -> vector<1x8x8xf32>
    "tpu.trace_stop"() : () -> ()
    %52 = vector.extract_strided_slice %32 {offsets = [0, 0, 8], sizes = [1, 8, 8], strides = [1, 1, 1]} : vector<1x8x96xf32> to vector<1x8x8xf32>
    %53 = arith.truncf %52 : vector<1x8x8xf32> to vector<1x8x8xbf16>
    %54 = vector.extract_strided_slice %32 {offsets = [0, 0, 40], sizes = [1, 8, 8], strides = [1, 1, 1]} : vector<1x8x96xf32> to vector<1x8x8xf32>
    %55 = arith.truncf %54 : vector<1x8x8xf32> to vector<1x8x8xbf16>
    %56 = vector.extract_strided_slice %32 {offsets = [0, 0, 72], sizes = [1, 8, 8], strides = [1, 1, 1]} : vector<1x8x96xf32> to vector<1x8x8xf32>
    %57 = arith.truncf %56 : vector<1x8x8xf32> to vector<1x8x8xbf16>
    "tpu.trace_start"() <{level = 10 : i32, message = "bqe,bke->bqk"}> : () -> ()
    %cst_19 = arith.constant dense<0.000000e+00> : vector<1x8x8xf32>
    %58 = tpu.matmul %53, %55, %cst_19 {dimension_numbers = #tpu.dot_dimension_numbers<[2], [2], [1], [1], [0, 0, 0, 1, 1, 1], [0], [0]>} : vector<1x8x8xbf16>, vector<1x8x8xbf16>, vector<1x8x8xf32> -> vector<1x8x8xf32>
    "tpu.trace_stop"() : () -> ()
    %cst_20 = arith.constant dense<0xFF800000> : vector<1x8xf32>
    %59 = vector.multi_reduction <maximumf>, %58, %cst_20 [2] : vector<1x8x8xf32> to vector<1x8xf32>
    %60 = vector.shape_cast %59 : vector<1x8xf32> to vector<1x8x1xf32>
    %61 = vector.broadcast %60 : vector<1x8x1xf32> to vector<1x8x8xf32>
    %62 = arith.subf %58, %61 : vector<1x8x8xf32>
    %63 = math.exp %62 : vector<1x8x8xf32>
    %cst_21 = arith.constant dense<0.000000e+00> : vector<1x8xf32>
    %64 = vector.multi_reduction <add>, %63, %cst_21 [2] : vector<1x8x8xf32> to vector<1x8xf32>
    %65 = vector.shape_cast %64 : vector<1x8xf32> to vector<1x8x1xf32>
    %66 = tpu.reciprocal %65 : vector<1x8x1xf32> -> vector<1x8x1xf32>
    %67 = vector.broadcast %66 : vector<1x8x1xf32> to vector<1x8x8xf32>
    %68 = arith.mulf %63, %67 : vector<1x8x8xf32>
    %69 = arith.truncf %68 : vector<1x8x8xf32> to vector<1x8x8xbf16>
    "tpu.trace_start"() <{level = 10 : i32, message = "bqk,bke->bqe"}> : () -> ()
    %cst_22 = arith.constant dense<0.000000e+00> : vector<1x8x8xf32>
    %70 = tpu.matmul %69, %57, %cst_22 {dimension_numbers = #tpu.dot_dimension_numbers<[2], [1], [1], [2], [0, 0, 0, 1, 1, 2], [0], [0]>} : vector<1x8x8xbf16>, vector<1x8x8xbf16>, vector<1x8x8xf32> -> vector<1x8x8xf32>
    "tpu.trace_stop"() : () -> ()
    %71 = vector.extract_strided_slice %32 {offsets = [0, 0, 16], sizes = [1, 8, 8], strides = [1, 1, 1]} : vector<1x8x96xf32> to vector<1x8x8xf32>
    %72 = arith.truncf %71 : vector<1x8x8xf32> to vector<1x8x8xbf16>
    %73 = vector.extract_strided_slice %32 {offsets = [0, 0, 48], sizes = [1, 8, 8], strides = [1, 1, 1]} : vector<1x8x96xf32> to vector<1x8x8xf32>
    %74 = arith.truncf %73 : vector<1x8x8xf32> to vector<1x8x8xbf16>
    %75 = vector.extract_strided_slice %32 {offsets = [0, 0, 80], sizes = [1, 8, 8], strides = [1, 1, 1]} : vector<1x8x96xf32> to vector<1x8x8xf32>
    %76 = arith.truncf %75 : vector<1x8x8xf32> to vector<1x8x8xbf16>
    "tpu.trace_start"() <{level = 10 : i32, message = "bqe,bke->bqk"}> : () -> ()
    %cst_23 = arith.constant dense<0.000000e+00> : vector<1x8x8xf32>
    %77 = tpu.matmul %72, %74, %cst_23 {dimension_numbers = #tpu.dot_dimension_numbers<[2], [2], [1], [1], [0, 0, 0, 1, 1, 1], [0], [0]>} : vector<1x8x8xbf16>, vector<1x8x8xbf16>, vector<1x8x8xf32> -> vector<1x8x8xf32>
    "tpu.trace_stop"() : () -> ()
    %cst_24 = arith.constant dense<0xFF800000> : vector<1x8xf32>
    %78 = vector.multi_reduction <maximumf>, %77, %cst_24 [2] : vector<1x8x8xf32> to vector<1x8xf32>
    %79 = vector.shape_cast %78 : vector<1x8xf32> to vector<1x8x1xf32>
    %80 = vector.broadcast %79 : vector<1x8x1xf32> to vector<1x8x8xf32>
    %81 = arith.subf %77, %80 : vector<1x8x8xf32>
    %82 = math.exp %81 : vector<1x8x8xf32>
    %cst_25 = arith.constant dense<0.000000e+00> : vector<1x8xf32>
    %83 = vector.multi_reduction <add>, %82, %cst_25 [2] : vector<1x8x8xf32> to vector<1x8xf32>
    %84 = vector.shape_cast %83 : vector<1x8xf32> to vector<1x8x1xf32>
    %85 = tpu.reciprocal %84 : vector<1x8x1xf32> -> vector<1x8x1xf32>
    %86 = vector.broadcast %85 : vector<1x8x1xf32> to vector<1x8x8xf32>
    %87 = arith.mulf %82, %86 : vector<1x8x8xf32>
    %88 = arith.truncf %87 : vector<1x8x8xf32> to vector<1x8x8xbf16>
    "tpu.trace_start"() <{level = 10 : i32, message = "bqk,bke->bqe"}> : () -> ()
    %cst_26 = arith.constant dense<0.000000e+00> : vector<1x8x8xf32>
    %89 = tpu.matmul %88, %76, %cst_26 {dimension_numbers = #tpu.dot_dimension_numbers<[2], [1], [1], [2], [0, 0, 0, 1, 1, 2], [0], [0]>} : vector<1x8x8xbf16>, vector<1x8x8xbf16>, vector<1x8x8xf32> -> vector<1x8x8xf32>
    "tpu.trace_stop"() : () -> ()
    %90 = vector.extract_strided_slice %32 {offsets = [0, 0, 24], sizes = [1, 8, 8], strides = [1, 1, 1]} : vector<1x8x96xf32> to vector<1x8x8xf32>
    %91 = arith.truncf %90 : vector<1x8x8xf32> to vector<1x8x8xbf16>
    %92 = vector.extract_strided_slice %32 {offsets = [0, 0, 56], sizes = [1, 8, 8], strides = [1, 1, 1]} : vector<1x8x96xf32> to vector<1x8x8xf32>
    %93 = arith.truncf %92 : vector<1x8x8xf32> to vector<1x8x8xbf16>
    %94 = vector.extract_strided_slice %32 {offsets = [0, 0, 88], sizes = [1, 8, 8], strides = [1, 1, 1]} : vector<1x8x96xf32> to vector<1x8x8xf32>
    %95 = arith.truncf %94 : vector<1x8x8xf32> to vector<1x8x8xbf16>
    "tpu.trace_start"() <{level = 10 : i32, message = "bqe,bke->bqk"}> : () -> ()
    %cst_27 = arith.constant dense<0.000000e+00> : vector<1x8x8xf32>
    %96 = tpu.matmul %91, %93, %cst_27 {dimension_numbers = #tpu.dot_dimension_numbers<[2], [2], [1], [1], [0, 0, 0, 1, 1, 1], [0], [0]>} : vector<1x8x8xbf16>, vector<1x8x8xbf16>, vector<1x8x8xf32> -> vector<1x8x8xf32>
    "tpu.trace_stop"() : () -> ()
    %cst_28 = arith.constant dense<0xFF800000> : vector<1x8xf32>
    %97 = vector.multi_reduction <maximumf>, %96, %cst_28 [2] : vector<1x8x8xf32> to vector<1x8xf32>
    %98 = vector.shape_cast %97 : vector<1x8xf32> to vector<1x8x1xf32>
    %99 = vector.broadcast %98 : vector<1x8x1xf32> to vector<1x8x8xf32>
    %100 = arith.subf %96, %99 : vector<1x8x8xf32>
    %101 = math.exp %100 : vector<1x8x8xf32>
    %cst_29 = arith.constant dense<0.000000e+00> : vector<1x8xf32>
    %102 = vector.multi_reduction <add>, %101, %cst_29 [2] : vector<1x8x8xf32> to vector<1x8xf32>
    %103 = vector.shape_cast %102 : vector<1x8xf32> to vector<1x8x1xf32>
    %104 = tpu.reciprocal %103 : vector<1x8x1xf32> -> vector<1x8x1xf32>
    %105 = vector.broadcast %104 : vector<1x8x1xf32> to vector<1x8x8xf32>
    %106 = arith.mulf %101, %105 : vector<1x8x8xf32>
    %107 = arith.truncf %106 : vector<1x8x8xf32> to vector<1x8x8xbf16>
    "tpu.trace_start"() <{level = 10 : i32, message = "bqk,bke->bqe"}> : () -> ()
    %cst_30 = arith.constant dense<0.000000e+00> : vector<1x8x8xf32>
    %108 = tpu.matmul %107, %95, %cst_30 {dimension_numbers = #tpu.dot_dimension_numbers<[2], [1], [1], [2], [0, 0, 0, 1, 1, 2], [0], [0]>} : vector<1x8x8xbf16>, vector<1x8x8xbf16>, vector<1x8x8xf32> -> vector<1x8x8xf32>
    "tpu.trace_stop"() : () -> ()
    %109 = tpu.concatenate %51, %70, %89, %108 in 2 : vector<1x8x8xf32>, vector<1x8x8xf32>, vector<1x8x8xf32>, vector<1x8x8xf32> -> vector<1x8x32xf32>
    %110 = vector.shape_cast %109 : vector<1x8x32xf32> to vector<8x32xf32>
    %111 = arith.truncf %110 : vector<8x32xf32> to vector<8x32xbf16>
    %c0_31 = arith.constant 0 : index
    %c0_32 = arith.constant 0 : index
    %112 = vector.load %arg4[%c0_31, %c0_32] : memref<32x32xbf16, #tpu.memory_space<vmem>>, vector<32x32xbf16>
    %cst_33 = arith.constant dense<0.000000e+00> : vector<8x32xf32>
    %113 = tpu.matmul %111, %112, %cst_33 {dimension_numbers = #tpu.dot_dimension_numbers<[1], [0], [0], [1], [0, 0, 1, 1], [], []>} : vector<8x32xbf16>, vector<32x32xbf16>, vector<8x32xf32> -> vector<8x32xf32>
    %c0_34 = arith.constant 0 : index
    %c0_35 = arith.constant 0 : index
    %114 = vector.load %arg5[%c0_34, %c0_35] : memref<1x32xf32, #tpu.memory_space<vmem>>, vector<1x32xf32>
    %115 = vector.broadcast %114 : vector<1x32xf32> to vector<8x32xf32>
    %116 = arith.addf %113, %115 : vector<8x32xf32>
    %117 = arith.addf %1, %116 : vector<8x32xf32>
    %c0_36 = arith.constant 0 : index
    %c0_37 = arith.constant 0 : index
    %118 = vector.load %arg8[%c0_36, %c0_37] : memref<1x32xf32, #tpu.memory_space<vmem>>, vector<1x32xf32>
    %c0_38 = arith.constant 0 : index
    %c0_39 = arith.constant 0 : index
    %119 = vector.load %arg9[%c0_38, %c0_39] : memref<1x32xf32, #tpu.memory_space<vmem>>, vector<1x32xf32>
    %cst_40 = arith.constant dense<0.000000e+00> : vector<8xf32>
    %120 = vector.multi_reduction <add>, %117, %cst_40 [1] : vector<8x32xf32> to vector<8xf32>
    %121 = vector.shape_cast %120 : vector<8xf32> to vector<8x1xf32>
    %cst_41 = arith.constant 3.200000e+01 : f32
    %122 = vector.broadcast %cst_41 : f32 to vector<8x1xf32>
    %123 = arith.divf %121, %122 : vector<8x1xf32>
    %124 = vector.broadcast %123 : vector<8x1xf32> to vector<8x32xf32>
    %125 = arith.subf %117, %124 : vector<8x32xf32>
    %126 = arith.mulf %125, %125 : vector<8x32xf32>
    %cst_42 = arith.constant dense<0.000000e+00> : vector<8xf32>
    %127 = vector.multi_reduction <add>, %126, %cst_42 [1] : vector<8x32xf32> to vector<8xf32>
    %128 = vector.shape_cast %127 : vector<8xf32> to vector<8x1xf32>
    %cst_43 = arith.constant 3.200000e+01 : f32
    %129 = vector.broadcast %cst_43 : f32 to vector<8x1xf32>
    %130 = arith.divf %128, %129 : vector<8x1xf32>
    %131 = vector.broadcast %123 : vector<8x1xf32> to vector<8x32xf32>
    %132 = arith.subf %117, %131 : vector<8x32xf32>
    %cst_44 = arith.constant 9.99999997E-7 : f32
    %133 = vector.broadcast %cst_44 : f32 to vector<8x1xf32>
    %134 = arith.addf %130, %133 : vector<8x1xf32>
    %135 = math.rsqrt %134 : vector<8x1xf32>
    %136 = vector.broadcast %135 : vector<8x1xf32> to vector<8x32xf32>
    %137 = arith.mulf %132, %136 : vector<8x32xf32>
    %138 = vector.broadcast %118 : vector<1x32xf32> to vector<8x32xf32>
    %139 = arith.mulf %137, %138 : vector<8x32xf32>
    %140 = vector.broadcast %119 : vector<1x32xf32> to vector<8x32xf32>
    %141 = arith.addf %139, %140 : vector<8x32xf32>
    %142 = arith.truncf %141 : vector<8x32xf32> to vector<8x32xbf16>
    %c0_45 = arith.constant 0 : index
    %c0_46 = arith.constant 0 : index
    %143 = vector.load %arg10[%c0_45, %c0_46] : memref<32x64xbf16, #tpu.memory_space<vmem>>, vector<32x64xbf16>
    %cst_47 = arith.constant dense<0.000000e+00> : vector<8x64xf32>
    %144 = tpu.matmul %142, %143, %cst_47 {dimension_numbers = #tpu.dot_dimension_numbers<[1], [0], [0], [1], [0, 0, 1, 1], [], []>} : vector<8x32xbf16>, vector<32x64xbf16>, vector<8x64xf32> -> vector<8x64xf32>
    %c0_48 = arith.constant 0 : index
    %c0_49 = arith.constant 0 : index
    %145 = vector.load %arg11[%c0_48, %c0_49] : memref<1x64xf32, #tpu.memory_space<vmem>>, vector<1x64xf32>
    %146 = vector.broadcast %145 : vector<1x64xf32> to vector<8x64xf32>
    %147 = arith.addf %144, %146 : vector<8x64xf32>
    %cst_50 = arith.constant 0.000000e+00 : f32
    %148 = vector.broadcast %cst_50 : f32 to vector<8x64xf32>
    %149 = arith.maximumf %147, %148 : vector<8x64xf32>
    %150 = arith.truncf %149 : vector<8x64xf32> to vector<8x64xbf16>
    %c0_51 = arith.constant 0 : index
    %c0_52 = arith.constant 0 : index
    %151 = vector.load %arg12[%c0_51, %c0_52] : memref<64x32xbf16, #tpu.memory_space<vmem>>, vector<64x32xbf16>
    %cst_53 = arith.constant dense<0.000000e+00> : vector<8x32xf32>
    %152 = tpu.matmul %150, %151, %cst_53 {dimension_numbers = #tpu.dot_dimension_numbers<[1], [0], [0], [1], [0, 0, 1, 1], [], []>} : vector<8x64xbf16>, vector<64x32xbf16>, vector<8x32xf32> -> vector<8x32xf32>
    %c0_54 = arith.constant 0 : index
    %c0_55 = arith.constant 0 : index
    %153 = vector.load %arg13[%c0_54, %c0_55] : memref<1x32xf32, #tpu.memory_space<vmem>>, vector<1x32xf32>
    %154 = vector.broadcast %153 : vector<1x32xf32> to vector<8x32xf32>
    %155 = arith.addf %152, %154 : vector<8x32xf32>
    %156 = arith.addf %117, %155 : vector<8x32xf32>
    %c0_56 = arith.constant 0 : index
    %c0_57 = arith.constant 0 : index
    %157 = vector.load %arg14[%c0_56, %c0_57] : memref<1x32xf32, #tpu.memory_space<vmem>>, vector<1x32xf32>
    %c0_58 = arith.constant 0 : index
    %c0_59 = arith.constant 0 : index
    %158 = vector.load %arg15[%c0_58, %c0_59] : memref<1x32xf32, #tpu.memory_space<vmem>>, vector<1x32xf32>
    %cst_60 = arith.constant dense<0.000000e+00> : vector<8xf32>
    %159 = vector.multi_reduction <add>, %156, %cst_60 [1] : vector<8x32xf32> to vector<8xf32>
    %160 = vector.shape_cast %159 : vector<8xf32> to vector<8x1xf32>
    %cst_61 = arith.constant 3.200000e+01 : f32
    %161 = vector.broadcast %cst_61 : f32 to vector<8x1xf32>
    %162 = arith.divf %160, %161 : vector<8x1xf32>
    %163 = vector.broadcast %162 : vector<8x1xf32> to vector<8x32xf32>
    %164 = arith.subf %156, %163 : vector<8x32xf32>
    %165 = arith.mulf %164, %164 : vector<8x32xf32>
    %cst_62 = arith.constant dense<0.000000e+00> : vector<8xf32>
    %166 = vector.multi_reduction <add>, %165, %cst_62 [1] : vector<8x32xf32> to vector<8xf32>
    %167 = vector.shape_cast %166 : vector<8xf32> to vector<8x1xf32>
    %cst_63 = arith.constant 3.200000e+01 : f32
    %168 = vector.broadcast %cst_63 : f32 to vector<8x1xf32>
    %169 = arith.divf %167, %168 : vector<8x1xf32>
    %170 = vector.broadcast %162 : vector<8x1xf32> to vector<8x32xf32>
    %171 = arith.subf %156, %170 : vector<8x32xf32>
    %cst_64 = arith.constant 9.99999997E-7 : f32
    %172 = vector.broadcast %cst_64 : f32 to vector<8x1xf32>
    %173 = arith.addf %169, %172 : vector<8x1xf32>
    %174 = math.rsqrt %173 : vector<8x1xf32>
    %175 = vector.broadcast %174 : vector<8x1xf32> to vector<8x32xf32>
    %176 = arith.mulf %171, %175 : vector<8x32xf32>
    %177 = vector.broadcast %157 : vector<1x32xf32> to vector<8x32xf32>
    %178 = arith.mulf %176, %177 : vector<8x32xf32>
    %179 = vector.broadcast %158 : vector<1x32xf32> to vector<8x32xf32>
    %180 = arith.addf %178, %179 : vector<8x32xf32>
    %c1_i32 = arith.constant 1 : i32
    %c0_65 = arith.constant 0 : index
    %c0_66 = arith.constant 0 : index
    %181 = vector.load %arg6[%c0_65, %c0_66] : memref<1x32xf32, #tpu.memory_space<vmem>>, vector<1x32xf32>
    %c0_67 = arith.constant 0 : index
    %c0_68 = arith.constant 0 : index
    %182 = vector.load %arg7[%c0_67, %c0_68] : memref<1x32xf32, #tpu.memory_space<vmem>>, vector<1x32xf32>
    %cst_69 = arith.constant dense<0.000000e+00> : vector<8xf32>
    %183 = vector.multi_reduction <add>, %180, %cst_69 [1] : vector<8x32xf32> to vector<8xf32>
    %184 = vector.shape_cast %183 : vector<8xf32> to vector<8x1xf32>
    %cst_70 = arith.constant 3.200000e+01 : f32
    %185 = vector.broadcast %cst_70 : f32 to vector<8x1xf32>
    %186 = arith.divf %184, %185 : vector<8x1xf32>
    %187 = vector.broadcast %186 : vector<8x1xf32> to vector<8x32xf32>
    %188 = arith.subf %180, %187 : vector<8x32xf32>
    %189 = arith.mulf %188, %188 : vector<8x32xf32>
    %cst_71 = arith.constant dense<0.000000e+00> : vector<8xf32>
    %190 = vector.multi_reduction <add>, %189, %cst_71 [1] : vector<8x32xf32> to vector<8xf32>
    %191 = vector.shape_cast %190 : vector<8xf32> to vector<8x1xf32>
    %cst_72 = arith.constant 3.200000e+01 : f32
    %192 = vector.broadcast %cst_72 : f32 to vector<8x1xf32>
    %193 = arith.divf %191, %192 : vector<8x1xf32>
    %194 = vector.broadcast %186 : vector<8x1xf32> to vector<8x32xf32>
    %195 = arith.subf %180, %194 : vector<8x32xf32>
    %cst_73 = arith.constant 9.99999997E-7 : f32
    %196 = vector.broadcast %cst_73 : f32 to vector<8x1xf32>
    %197 = arith.addf %193, %196 : vector<8x1xf32>
    %198 = math.rsqrt %197 : vector<8x1xf32>
    %199 = vector.broadcast %198 : vector<8x1xf32> to vector<8x32xf32>
    %200 = arith.mulf %195, %199 : vector<8x32xf32>
    %201 = vector.broadcast %181 : vector<1x32xf32> to vector<8x32xf32>
    %202 = arith.mulf %200, %201 : vector<8x32xf32>
    %203 = vector.broadcast %182 : vector<1x32xf32> to vector<8x32xf32>
    %204 = arith.addf %202, %203 : vector<8x32xf32>
    %205 = arith.truncf %204 : vector<8x32xf32> to vector<8x32xbf16>
    %c0_74 = arith.constant 0 : index
    %c0_75 = arith.constant 0 : index
    %206 = vector.load %arg2[%c0_74, %c0_75] : memref<32x96xbf16, #tpu.memory_space<vmem>>, vector<32x96xbf16>
    %cst_76 = arith.constant dense<0.000000e+00> : vector<8x96xf32>
    %207 = tpu.matmul %205, %206, %cst_76 {dimension_numbers = #tpu.dot_dimension_numbers<[1], [0], [0], [1], [0, 0, 1, 1], [], []>} : vector<8x32xbf16>, vector<32x96xbf16>, vector<8x96xf32> -> vector<8x96xf32>
    %c0_77 = arith.constant 0 : index
    %c0_78 = arith.constant 0 : index
    %208 = vector.load %arg3[%c0_77, %c0_78] : memref<1x96xf32, #tpu.memory_space<vmem>>, vector<1x96xf32>
    %209 = vector.broadcast %208 : vector<1x96xf32> to vector<8x96xf32>
    %210 = arith.addf %207, %209 : vector<8x96xf32>
    %211 = vector.shape_cast %210 : vector<8x96xf32> to vector<1x8x96xf32>
    %212 = vector.extract_strided_slice %211 {offsets = [0, 0, 0], sizes = [1, 8, 8], strides = [1, 1, 1]} : vector<1x8x96xf32> to vector<1x8x8xf32>
    %213 = arith.truncf %212 : vector<1x8x8xf32> to vector<1x8x8xbf16>
    %214 = vector.extract_strided_slice %211 {offsets = [0, 0, 32], sizes = [1, 8, 8], strides = [1, 1, 1]} : vector<1x8x96xf32> to vector<1x8x8xf32>
    %215 = arith.truncf %214 : vector<1x8x8xf32> to vector<1x8x8xbf16>
    %216 = vector.extract_strided_slice %211 {offsets = [0, 0, 64], sizes = [1, 8, 8], strides = [1, 1, 1]} : vector<1x8x96xf32> to vector<1x8x8xf32>
    %217 = arith.truncf %216 : vector<1x8x8xf32> to vector<1x8x8xbf16>
    "tpu.trace_start"() <{level = 10 : i32, message = "bqe,bke->bqk"}> : () -> ()
    %cst_79 = arith.constant dense<0.000000e+00> : vector<1x8x8xf32>
    %218 = tpu.matmul %213, %215, %cst_79 {dimension_numbers = #tpu.dot_dimension_numbers<[2], [2], [1], [1], [0, 0, 0, 1, 1, 1], [0], [0]>} : vector<1x8x8xbf16>, vector<1x8x8xbf16>, vector<1x8x8xf32> -> vector<1x8x8xf32>
    "tpu.trace_stop"() : () -> ()
    %cst_80 = arith.constant dense<0xFF800000> : vector<1x8xf32>
    %219 = vector.multi_reduction <maximumf>, %218, %cst_80 [2] : vector<1x8x8xf32> to vector<1x8xf32>
    %220 = vector.shape_cast %219 : vector<1x8xf32> to vector<1x8x1xf32>
    %221 = vector.broadcast %220 : vector<1x8x1xf32> to vector<1x8x8xf32>
    %222 = arith.subf %218, %221 : vector<1x8x8xf32>
    %223 = math.exp %222 : vector<1x8x8xf32>
    %cst_81 = arith.constant dense<0.000000e+00> : vector<1x8xf32>
    %224 = vector.multi_reduction <add>, %223, %cst_81 [2] : vector<1x8x8xf32> to vector<1x8xf32>
    %225 = vector.shape_cast %224 : vector<1x8xf32> to vector<1x8x1xf32>
    %226 = tpu.reciprocal %225 : vector<1x8x1xf32> -> vector<1x8x1xf32>
    %227 = vector.broadcast %226 : vector<1x8x1xf32> to vector<1x8x8xf32>
    %228 = arith.mulf %223, %227 : vector<1x8x8xf32>
    %229 = arith.truncf %228 : vector<1x8x8xf32> to vector<1x8x8xbf16>
    "tpu.trace_start"() <{level = 10 : i32, message = "bqk,bke->bqe"}> : () -> ()
    %cst_82 = arith.constant dense<0.000000e+00> : vector<1x8x8xf32>
    %230 = tpu.matmul %229, %217, %cst_82 {dimension_numbers = #tpu.dot_dimension_numbers<[2], [1], [1], [2], [0, 0, 0, 1, 1, 2], [0], [0]>} : vector<1x8x8xbf16>, vector<1x8x8xbf16>, vector<1x8x8xf32> -> vector<1x8x8xf32>
    "tpu.trace_stop"() : () -> ()
    %231 = vector.extract_strided_slice %211 {offsets = [0, 0, 8], sizes = [1, 8, 8], strides = [1, 1, 1]} : vector<1x8x96xf32> to vector<1x8x8xf32>
    %232 = arith.truncf %231 : vector<1x8x8xf32> to vector<1x8x8xbf16>
    %233 = vector.extract_strided_slice %211 {offsets = [0, 0, 40], sizes = [1, 8, 8], strides = [1, 1, 1]} : vector<1x8x96xf32> to vector<1x8x8xf32>
    %234 = arith.truncf %233 : vector<1x8x8xf32> to vector<1x8x8xbf16>
    %235 = vector.extract_strided_slice %211 {offsets = [0, 0, 72], sizes = [1, 8, 8], strides = [1, 1, 1]} : vector<1x8x96xf32> to vector<1x8x8xf32>
    %236 = arith.truncf %235 : vector<1x8x8xf32> to vector<1x8x8xbf16>
    "tpu.trace_start"() <{level = 10 : i32, message = "bqe,bke->bqk"}> : () -> ()
    %cst_83 = arith.constant dense<0.000000e+00> : vector<1x8x8xf32>
    %237 = tpu.matmul %232, %234, %cst_83 {dimension_numbers = #tpu.dot_dimension_numbers<[2], [2], [1], [1], [0, 0, 0, 1, 1, 1], [0], [0]>} : vector<1x8x8xbf16>, vector<1x8x8xbf16>, vector<1x8x8xf32> -> vector<1x8x8xf32>
    "tpu.trace_stop"() : () -> ()
    %cst_84 = arith.constant dense<0xFF800000> : vector<1x8xf32>
    %238 = vector.multi_reduction <maximumf>, %237, %cst_84 [2] : vector<1x8x8xf32> to vector<1x8xf32>
    %239 = vector.shape_cast %238 : vector<1x8xf32> to vector<1x8x1xf32>
    %240 = vector.broadcast %239 : vector<1x8x1xf32> to vector<1x8x8xf32>
    %241 = arith.subf %237, %240 : vector<1x8x8xf32>
    %242 = math.exp %241 : vector<1x8x8xf32>
    %cst_85 = arith.constant dense<0.000000e+00> : vector<1x8xf32>
    %243 = vector.multi_reduction <add>, %242, %cst_85 [2] : vector<1x8x8xf32> to vector<1x8xf32>
    %244 = vector.shape_cast %243 : vector<1x8xf32> to vector<1x8x1xf32>
    %245 = tpu.reciprocal %244 : vector<1x8x1xf32> -> vector<1x8x1xf32>
    %246 = vector.broadcast %245 : vector<1x8x1xf32> to vector<1x8x8xf32>
    %247 = arith.mulf %242, %246 : vector<1x8x8xf32>
    %248 = arith.truncf %247 : vector<1x8x8xf32> to vector<1x8x8xbf16>
    "tpu.trace_start"() <{level = 10 : i32, message = "bqk,bke->bqe"}> : () -> ()
    %cst_86 = arith.constant dense<0.000000e+00> : vector<1x8x8xf32>
    %249 = tpu.matmul %248, %236, %cst_86 {dimension_numbers = #tpu.dot_dimension_numbers<[2], [1], [1], [2], [0, 0, 0, 1, 1, 2], [0], [0]>} : vector<1x8x8xbf16>, vector<1x8x8xbf16>, vector<1x8x8xf32> -> vector<1x8x8xf32>
    "tpu.trace_stop"() : () -> ()
    %250 = vector.extract_strided_slice %211 {offsets = [0, 0, 16], sizes = [1, 8, 8], strides = [1, 1, 1]} : vector<1x8x96xf32> to vector<1x8x8xf32>
    %251 = arith.truncf %250 : vector<1x8x8xf32> to vector<1x8x8xbf16>
    %252 = vector.extract_strided_slice %211 {offsets = [0, 0, 48], sizes = [1, 8, 8], strides = [1, 1, 1]} : vector<1x8x96xf32> to vector<1x8x8xf32>
    %253 = arith.truncf %252 : vector<1x8x8xf32> to vector<1x8x8xbf16>
    %254 = vector.extract_strided_slice %211 {offsets = [0, 0, 80], sizes = [1, 8, 8], strides = [1, 1, 1]} : vector<1x8x96xf32> to vector<1x8x8xf32>
    %255 = arith.truncf %254 : vector<1x8x8xf32> to vector<1x8x8xbf16>
    "tpu.trace_start"() <{level = 10 : i32, message = "bqe,bke->bqk"}> : () -> ()
    %cst_87 = arith.constant dense<0.000000e+00> : vector<1x8x8xf32>
    %256 = tpu.matmul %251, %253, %cst_87 {dimension_numbers = #tpu.dot_dimension_numbers<[2], [2], [1], [1], [0, 0, 0, 1, 1, 1], [0], [0]>} : vector<1x8x8xbf16>, vector<1x8x8xbf16>, vector<1x8x8xf32> -> vector<1x8x8xf32>
    "tpu.trace_stop"() : () -> ()
    %cst_88 = arith.constant dense<0xFF800000> : vector<1x8xf32>
    %257 = vector.multi_reduction <maximumf>, %256, %cst_88 [2] : vector<1x8x8xf32> to vector<1x8xf32>
    %258 = vector.shape_cast %257 : vector<1x8xf32> to vector<1x8x1xf32>
    %259 = vector.broadcast %258 : vector<1x8x1xf32> to vector<1x8x8xf32>
    %260 = arith.subf %256, %259 : vector<1x8x8xf32>
    %261 = math.exp %260 : vector<1x8x8xf32>
    %cst_89 = arith.constant dense<0.000000e+00> : vector<1x8xf32>
    %262 = vector.multi_reduction <add>, %261, %cst_89 [2] : vector<1x8x8xf32> to vector<1x8xf32>
    %263 = vector.shape_cast %262 : vector<1x8xf32> to vector<1x8x1xf32>
    %264 = tpu.reciprocal %263 : vector<1x8x1xf32> -> vector<1x8x1xf32>
    %265 = vector.broadcast %264 : vector<1x8x1xf32> to vector<1x8x8xf32>
    %266 = arith.mulf %261, %265 : vector<1x8x8xf32>
    %267 = arith.truncf %266 : vector<1x8x8xf32> to vector<1x8x8xbf16>
    "tpu.trace_start"() <{level = 10 : i32, message = "bqk,bke->bqe"}> : () -> ()
    %cst_90 = arith.constant dense<0.000000e+00> : vector<1x8x8xf32>
    %268 = tpu.matmul %267, %255, %cst_90 {dimension_numbers = #tpu.dot_dimension_numbers<[2], [1], [1], [2], [0, 0, 0, 1, 1, 2], [0], [0]>} : vector<1x8x8xbf16>, vector<1x8x8xbf16>, vector<1x8x8xf32> -> vector<1x8x8xf32>
    "tpu.trace_stop"() : () -> ()
    %269 = vector.extract_strided_slice %211 {offsets = [0, 0, 24], sizes = [1, 8, 8], strides = [1, 1, 1]} : vector<1x8x96xf32> to vector<1x8x8xf32>
    %270 = arith.truncf %269 : vector<1x8x8xf32> to vector<1x8x8xbf16>
    %271 = vector.extract_strided_slice %211 {offsets = [0, 0, 56], sizes = [1, 8, 8], strides = [1, 1, 1]} : vector<1x8x96xf32> to vector<1x8x8xf32>
    %272 = arith.truncf %271 : vector<1x8x8xf32> to vector<1x8x8xbf16>
    %273 = vector.extract_strided_slice %211 {offsets = [0, 0, 88], sizes = [1, 8, 8], strides = [1, 1, 1]} : vector<1x8x96xf32> to vector<1x8x8xf32>
    %274 = arith.truncf %273 : vector<1x8x8xf32> to vector<1x8x8xbf16>
    "tpu.trace_start"() <{level = 10 : i32, message = "bqe,bke->bqk"}> : () -> ()
    %cst_91 = arith.constant dense<0.000000e+00> : vector<1x8x8xf32>
    %275 = tpu.matmul %270, %272, %cst_91 {dimension_numbers = #tpu.dot_dimension_numbers<[2], [2], [1], [1], [0, 0, 0, 1, 1, 1], [0], [0]>} : vector<1x8x8xbf16>, vector<1x8x8xbf16>, vector<1x8x8xf32> -> vector<1x8x8xf32>
    "tpu.trace_stop"() : () -> ()
    %cst_92 = arith.constant dense<0xFF800000> : vector<1x8xf32>
    %276 = vector.multi_reduction <maximumf>, %275, %cst_92 [2] : vector<1x8x8xf32> to vector<1x8xf32>
    %277 = vector.shape_cast %276 : vector<1x8xf32> to vector<1x8x1xf32>
    %278 = vector.broadcast %277 : vector<1x8x1xf32> to vector<1x8x8xf32>
    %279 = arith.subf %275, %278 : vector<1x8x8xf32>
    %280 = math.exp %279 : vector<1x8x8xf32>
    %cst_93 = arith.constant dense<0.000000e+00> : vector<1x8xf32>
    %281 = vector.multi_reduction <add>, %280, %cst_93 [2] : vector<1x8x8xf32> to vector<1x8xf32>
    %282 = vector.shape_cast %281 : vector<1x8xf32> to vector<1x8x1xf32>
    %283 = tpu.reciprocal %282 : vector<1x8x1xf32> -> vector<1x8x1xf32>
    %284 = vector.broadcast %283 : vector<1x8x1xf32> to vector<1x8x8xf32>
    %285 = arith.mulf %280, %284 : vector<1x8x8xf32>
    %286 = arith.truncf %285 : vector<1x8x8xf32> to vector<1x8x8xbf16>
    "tpu.trace_start"() <{level = 10 : i32, message = "bqk,bke->bqe"}> : () -> ()
    %cst_94 = arith.constant dense<0.000000e+00> : vector<1x8x8xf32>
    %287 = tpu.matmul %286, %274, %cst_94 {dimension_numbers = #tpu.dot_dimension_numbers<[2], [1], [1], [2], [0, 0, 0, 1, 1, 2], [0], [0]>} : vector<1x8x8xbf16>, vector<1x8x8xbf16>, vector<1x8x8xf32> -> vector<1x8x8xf32>
    "tpu.trace_stop"() : () -> ()
    %288 = tpu.concatenate %230, %249, %268, %287 in 2 : vector<1x8x8xf32>, vector<1x8x8xf32>, vector<1x8x8xf32>, vector<1x8x8xf32> -> vector<1x8x32xf32>
    %289 = vector.shape_cast %288 : vector<1x8x32xf32> to vector<8x32xf32>
    %290 = arith.truncf %289 : vector<8x32xf32> to vector<8x32xbf16>
    %c0_95 = arith.constant 0 : index
    %c0_96 = arith.constant 0 : index
    %291 = vector.load %arg4[%c0_95, %c0_96] : memref<32x32xbf16, #tpu.memory_space<vmem>>, vector<32x32xbf16>
    %cst_97 = arith.constant dense<0.000000e+00> : vector<8x32xf32>
    %292 = tpu.matmul %290, %291, %cst_97 {dimension_numbers = #tpu.dot_dimension_numbers<[1], [0], [0], [1], [0, 0, 1, 1], [], []>} : vector<8x32xbf16>, vector<32x32xbf16>, vector<8x32xf32> -> vector<8x32xf32>
    %c0_98 = arith.constant 0 : index
    %c0_99 = arith.constant 0 : index
    %293 = vector.load %arg5[%c0_98, %c0_99] : memref<1x32xf32, #tpu.memory_space<vmem>>, vector<1x32xf32>
    %294 = vector.broadcast %293 : vector<1x32xf32> to vector<8x32xf32>
    %295 = arith.addf %292, %294 : vector<8x32xf32>
    %296 = arith.addf %180, %295 : vector<8x32xf32>
    %c0_100 = arith.constant 0 : index
    %c0_101 = arith.constant 0 : index
    %297 = vector.load %arg8[%c0_100, %c0_101] : memref<1x32xf32, #tpu.memory_space<vmem>>, vector<1x32xf32>
    %c0_102 = arith.constant 0 : index
    %c0_103 = arith.constant 0 : index
    %298 = vector.load %arg9[%c0_102, %c0_103] : memref<1x32xf32, #tpu.memory_space<vmem>>, vector<1x32xf32>
    %cst_104 = arith.constant dense<0.000000e+00> : vector<8xf32>
    %299 = vector.multi_reduction <add>, %296, %cst_104 [1] : vector<8x32xf32> to vector<8xf32>
    %300 = vector.shape_cast %299 : vector<8xf32> to vector<8x1xf32>
    %cst_105 = arith.constant 3.200000e+01 : f32
    %301 = vector.broadcast %cst_105 : f32 to vector<8x1xf32>
    %302 = arith.divf %300, %301 : vector<8x1xf32>
    %303 = vector.broadcast %302 : vector<8x1xf32> to vector<8x32xf32>
    %304 = arith.subf %296, %303 : vector<8x32xf32>
    %305 = arith.mulf %304, %304 : vector<8x32xf32>
    %cst_106 = arith.constant dense<0.000000e+00> : vector<8xf32>
    %306 = vector.multi_reduction <add>, %305, %cst_106 [1] : vector<8x32xf32> to vector<8xf32>
    %307 = vector.shape_cast %306 : vector<8xf32> to vector<8x1xf32>
    %cst_107 = arith.constant 3.200000e+01 : f32
    %308 = vector.broadcast %cst_107 : f32 to vector<8x1xf32>
    %309 = arith.divf %307, %308 : vector<8x1xf32>
    %310 = vector.broadcast %302 : vector<8x1xf32> to vector<8x32xf32>
    %311 = arith.subf %296, %310 : vector<8x32xf32>
    %cst_108 = arith.constant 9.99999997E-7 : f32
    %312 = vector.broadcast %cst_108 : f32 to vector<8x1xf32>
    %313 = arith.addf %309, %312 : vector<8x1xf32>
    %314 = math.rsqrt %313 : vector<8x1xf32>
    %315 = vector.broadcast %314 : vector<8x1xf32> to vector<8x32xf32>
    %316 = arith.mulf %311, %315 : vector<8x32xf32>
    %317 = vector.broadcast %297 : vector<1x32xf32> to vector<8x32xf32>
    %318 = arith.mulf %316, %317 : vector<8x32xf32>
    %319 = vector.broadcast %298 : vector<1x32xf32> to vector<8x32xf32>
    %320 = arith.addf %318, %319 : vector<8x32xf32>
    %321 = arith.truncf %320 : vector<8x32xf32> to vector<8x32xbf16>
    %c0_109 = arith.constant 0 : index
    %c0_110 = arith.constant 0 : index
    %322 = vector.load %arg10[%c0_109, %c0_110] : memref<32x64xbf16, #tpu.memory_space<vmem>>, vector<32x64xbf16>
    %cst_111 = arith.constant dense<0.000000e+00> : vector<8x64xf32>
    %323 = tpu.matmul %321, %322, %cst_111 {dimension_numbers = #tpu.dot_dimension_numbers<[1], [0], [0], [1], [0, 0, 1, 1], [], []>} : vector<8x32xbf16>, vector<32x64xbf16>, vector<8x64xf32> -> vector<8x64xf32>
    %c0_112 = arith.constant 0 : index
    %c0_113 = arith.constant 0 : index
    %324 = vector.load %arg11[%c0_112, %c0_113] : memref<1x64xf32, #tpu.memory_space<vmem>>, vector<1x64xf32>
    %325 = vector.broadcast %324 : vector<1x64xf32> to vector<8x64xf32>
    %326 = arith.addf %323, %325 : vector<8x64xf32>
    %cst_114 = arith.constant 0.000000e+00 : f32
    %327 = vector.broadcast %cst_114 : f32 to vector<8x64xf32>
    %328 = arith.maximumf %326, %327 : vector<8x64xf32>
    %329 = arith.truncf %328 : vector<8x64xf32> to vector<8x64xbf16>
    %c0_115 = arith.constant 0 : index
    %c0_116 = arith.constant 0 : index
    %330 = vector.load %arg12[%c0_115, %c0_116] : memref<64x32xbf16, #tpu.memory_space<vmem>>, vector<64x32xbf16>
    %cst_117 = arith.constant dense<0.000000e+00> : vector<8x32xf32>
    %331 = tpu.matmul %329, %330, %cst_117 {dimension_numbers = #tpu.dot_dimension_numbers<[1], [0], [0], [1], [0, 0, 1, 1], [], []>} : vector<8x64xbf16>, vector<64x32xbf16>, vector<8x32xf32> -> vector<8x32xf32>
    %c0_118 = arith.constant 0 : index
    %c0_119 = arith.constant 0 : index
    %332 = vector.load %arg13[%c0_118, %c0_119] : memref<1x32xf32, #tpu.memory_space<vmem>>, vector<1x32xf32>
    %333 = vector.broadcast %332 : vector<1x32xf32> to vector<8x32xf32>
    %334 = arith.addf %331, %333 : vector<8x32xf32>
    %335 = arith.addf %296, %334 : vector<8x32xf32>
    %c0_120 = arith.constant 0 : index
    %c0_121 = arith.constant 0 : index
    %336 = vector.load %arg14[%c0_120, %c0_121] : memref<1x32xf32, #tpu.memory_space<vmem>>, vector<1x32xf32>
    %c0_122 = arith.constant 0 : index
    %c0_123 = arith.constant 0 : index
    %337 = vector.load %arg15[%c0_122, %c0_123] : memref<1x32xf32, #tpu.memory_space<vmem>>, vector<1x32xf32>
    %cst_124 = arith.constant dense<0.000000e+00> : vector<8xf32>
    %338 = vector.multi_reduction <add>, %335, %cst_124 [1] : vector<8x32xf32> to vector<8xf32>
    %339 = vector.shape_cast %338 : vector<8xf32> to vector<8x1xf32>
    %cst_125 = arith.constant 3.200000e+01 : f32
    %340 = vector.broadcast %cst_125 : f32 to vector<8x1xf32>
    %341 = arith.divf %339, %340 : vector<8x1xf32>
    %342 = vector.broadcast %341 : vector<8x1xf32> to vector<8x32xf32>
    %343 = arith.subf %335, %342 : vector<8x32xf32>
    %344 = arith.mulf %343, %343 : vector<8x32xf32>
    %cst_126 = arith.constant dense<0.000000e+00> : vector<8xf32>
    %345 = vector.multi_reduction <add>, %344, %cst_126 [1] : vector<8x32xf32> to vector<8xf32>
    %346 = vector.shape_cast %345 : vector<8xf32> to vector<8x1xf32>
    %cst_127 = arith.constant 3.200000e+01 : f32
    %347 = vector.broadcast %cst_127 : f32 to vector<8x1xf32>
    %348 = arith.divf %346, %347 : vector<8x1xf32>
    %349 = vector.broadcast %341 : vector<8x1xf32> to vector<8x32xf32>
    %350 = arith.subf %335, %349 : vector<8x32xf32>
    %cst_128 = arith.constant 9.99999997E-7 : f32
    %351 = vector.broadcast %cst_128 : f32 to vector<8x1xf32>
    %352 = arith.addf %348, %351 : vector<8x1xf32>
    %353 = math.rsqrt %352 : vector<8x1xf32>
    %354 = vector.broadcast %353 : vector<8x1xf32> to vector<8x32xf32>
    %355 = arith.mulf %350, %354 : vector<8x32xf32>
    %356 = vector.broadcast %336 : vector<1x32xf32> to vector<8x32xf32>
    %357 = arith.mulf %355, %356 : vector<8x32xf32>
    %358 = vector.broadcast %337 : vector<1x32xf32> to vector<8x32xf32>
    %359 = arith.addf %357, %358 : vector<8x32xf32>
    %360 = vector.shape_cast %359 : vector<8x32xf32> to vector<1x8x32xf32>
    %c0_129 = arith.constant 0 : index
    %c0_130 = arith.constant 0 : index
    %c0_131 = arith.constant 0 : index
    %361 = vector.load %arg16[%c0_129, %c0_130, %c0_131] : memref<1x8x32xf32, #tpu.memory_space<vmem>>, vector<1x8x32xf32>
    tpu.vector_store %arg16[%c0_129, %c0_130, %c0_131], %360 {strides = array<i32>} : memref<1x8x32xf32, #tpu.memory_space<vmem>>, vector<1x8x32xf32>,
    return
  }
  func.func @transform_0(%arg0: i32) -> (i32, i32, i32) {
    %c0_i32 = arith.constant 0 : i32
    %c0_i32_0 = arith.constant 0 : i32
    %c0_i32_1 = arith.constant 0 : i32
    return %arg0, %c0_i32, %c0_i32_0 : i32, i32, i32
  }
  func.func @transform_1(%arg0: i32) -> (i32, i32) {
    %c0_i32 = arith.constant 0 : i32
    %c0_i32_0 = arith.constant 0 : i32
    %c0_i32_1 = arith.constant 0 : i32
    return %c0_i32, %c0_i32_0 : i32, i32
  }
  func.func @transform_2(%arg0: i32) -> (i32, i32) {
    %c0_i32 = arith.constant 0 : i32
    %c0_i32_0 = arith.constant 0 : i32
    %c0_i32_1 = arith.constant 0 : i32
    return %c0_i32, %c0_i32_0 : i32, i32
  }
  func.func @transform_3(%arg0: i32) -> (i32, i32) {
    %c0_i32 = arith.constant 0 : i32
    %c0_i32_0 = arith.constant 0 : i32
    %c0_i32_1 = arith.constant 0 : i32
    return %c0_i32, %c0_i32_0 : i32, i32
  }
  func.func @transform_4(%arg0: i32) -> (i32, i32) {
    %c0_i32 = arith.constant 0 : i32
    %c0_i32_0 = arith.constant 0 : i32
    %c0_i32_1 = arith.constant 0 : i32
    return %c0_i32, %c0_i32_0 : i32, i32
  }
  func.func @transform_5(%arg0: i32) -> (i32, i32) {
    %c0_i32 = arith.constant 0 : i32
    %c0_i32_0 = arith.constant 0 : i32
    %c0_i32_1 = arith.constant 0 : i32
    return %c0_i32, %c0_i32_0 : i32, i32
  }
  func.func @transform_6(%arg0: i32) -> (i32, i32) {
    %c0_i32 = arith.constant 0 : i32
    %c0_i32_0 = arith.constant 0 : i32
    %c0_i32_1 = arith.constant 0 : i32
    return %c0_i32, %c0_i32_0 : i32, i32
  }
  func.func @transform_7(%arg0: i32) -> (i32, i32) {
    %c0_i32 = arith.constant 0 : i32
    %c0_i32_0 = arith.constant 0 : i32
    %c0_i32_1 = arith.constant 0 : i32
    return %c0_i32, %c0_i32_0 : i32, i32
  }
  func.func @transform_8(%arg0: i32) -> (i32, i32) {
    %c0_i32 = arith.constant 0 : i32
    %c0_i32_0 = arith.constant 0 : i32
    %c0_i32_1 = arith.constant 0 : i32
    return %c0_i32, %c0_i32_0 : i32, i32
  }
  func.func @transform_9(%arg0: i32) -> (i32, i32) {
    %c0_i32 = arith.constant 0 : i32
    %c0_i32_0 = arith.constant 0 : i32
    %c0_i32_1 = arith.constant 0 : i32
    return %c0_i32, %c0_i32_0 : i32, i32
  }
  func.func @transform_10(%arg0: i32) -> (i32, i32) {
    %c0_i32 = arith.constant 0 : i32
    %c0_i32_0 = arith.constant 0 : i32
    %c0_i32_1 = arith.constant 0 : i32
    return %c0_i32, %c0_i32_0 : i32, i32
  }
  func.func @transform_11(%arg0: i32) -> (i32, i32) {
    %c0_i32 = arith.constant 0 : i32
    %c0_i32_0 = arith.constant 0 : i32
    %c0_i32_1 = arith.constant 0 : i32
    return %c0_i32, %c0_i32_0 : i32, i32
  }
  func.func @transform_12(%arg0: i32) -> (i32, i32) {
    %c0_i32 = arith.constant 0 : i32
    %c0_i32_0 = arith.constant 0 : i32
    %c0_i32_1 = arith.constant 0 : i32
    return %c0_i32, %c0_i32_0 : i32, i32
  }
  func.func @transform_13(%arg0: i32) -> (i32, i32) {
    %c0_i32 = arith.constant 0 : i32
    %c0_i32_0 = arith.constant 0 : i32
    %c0_i32_1 = arith.constant 0 : i32
    return %c0_i32, %c0_i32_0 : i32, i32
  }
  func.func @transform_14(%arg0: i32) -> (i32, i32) {
    %c0_i32 = arith.constant 0 : i32
    %c0_i32_0 = arith.constant 0 : i32
    %c0_i32_1 = arith.constant 0 : i32
    return %c0_i32, %c0_i32_0 : i32, i32
  }
  func.func @transform_15(%arg0: i32) -> (i32, i32, i32) {
    %c0_i32 = arith.constant 0 : i32
    %c0_i32_0 = arith.constant 0 : i32
    %c0_i32_1 = arith.constant 0 : i32
    return %arg0, %c0_i32, %c0_i32_0 : i32, i32, i32
  }
}

</mosaic_0001>

<bundles_post_ra>
// kernel: blocks_recycling.1
= control target key start
LH: loop header
LB: loop body
LE: loop exit
PB: predicated region body
PF: predicated region fallthrough
CT: control target
= control target key end

     0   :  { %s3253_s0 = inlined_call_operand.vmem [shape: f32[2,8,32], index: 0, kind: input, shape index: {}]   ;;  %s3254_s1 = inlined_call_operand.vmem [shape: bf16[32,96], index: 1, kind: input, shape index: {}]   ;;  %s3255_s2 = inlined_call_operand.vmem [shape: f32[1,96], index: 2, kind: input, shape index: {}]   ;;  %s3256_s3 = inlined_call_operand.vmem [shape: bf16[32,32], index: 3, kind: input, shape index: {}]   ;;  %s3257_s4 = inlined_call_operand.vmem [shape: f32[1,32], index: 4, kind: input, shape index: {}]   ;;  %s3258_s5 = inlined_call_operand.vmem [shape: f32[1,32], index: 5, kind: input, shape index: {}]   ;;  %s3259_s6 = inlined_call_operand.vmem [shape: f32[1,32], index: 6, kind: input, shape index: {}]   ;;  %s3260_s7 = inlined_call_operand.vmem [shape: f32[1,32], index: 7, kind: input, shape index: {}]   ;;  %s3261_s8 = inlined_call_operand.vmem [shape: f32[1,32], index: 8, kind: input, shape index: {}]   ;;  %s3262_s9 = inlined_call_operand.vmem [shape: bf16[32,64], index: 9, kind: input, shape index: {}]   ;;  %s3263_s10 = inlined_call_operand.vmem [shape: f32[1,64], index: 10, kind: input, shape index: {}]   ;;  %s3264_s11 = inlined_call_operand.vmem [shape: bf16[64,32], index: 11, kind: input, shape index: {}]   ;;  %s3265_s12 = inlined_call_operand.vmem [shape: f32[1,32], index: 12, kind: input, shape index: {}]   ;;  %s3266_s13 = inlined_call_operand.vmem [shape: f32[1,32], index: 13, kind: input, shape index: {}]   ;;  %s3267_s14 = inlined_call_operand.vmem [shape: f32[1,32], index: 14, kind: input, shape index: {}]   ;;  %s3268_s15 = inlined_call_operand.hbm [shape: f32[2,8,32], index: 15, kind: output, shape index: {}]  }
   0x1   :  { %3283 = sst [smem:[#allocation5_spill]] %s3253_s0 }
   0x2   :  { %3284 = sst [smem:[#allocation6_spill]] %s3254_s1 }
   0x3   :  { %3285 = sst [smem:[#allocation7_spill]] %s3255_s2 }
   0x4   :  { %3286 = sst [smem:[#allocation8_spill]] %s3256_s3 }
   0x5   :  { %3287 = sst [smem:[#allocation9_spill]] %s3257_s4 }
   0x6   :  { %3288 = sst [smem:[#allocation10_spill]] %s3258_s5 }
   0x7   :  { %20 = vsyncpa [#allocation3], 0 }
   0x8   :  { %22 = vsyncpa [#allocation3 + $0x1], 0  ;;  %s2811_s18 = smov 0   ;;  %s2813_s19 = smov 0  }
   0x9   :  { %s2815_s20 = smov 0   ;;  %s2817_s21 = smov 0  }
   0xa LB: > { %s2832_s22 = sadd.s32 4294967295, %s2712_s21   ;;  %s2231_s23 = sadd.s32 4294967294, %s2712_s21   ;;  %s2712_s21 = sphi %s2817_s21, %s3314_s21   ;;  %s2708_s20 = sphi %s2815_s20, %s3313_s20   ;;  %s2704_s19 = sphi %s2813_s19, %s3312_s19   ;;  %s2700_s18 = sphi %s2811_s18, %s3311_s18  }
   0xb   : > { %s2836_s24 = sadd.s32 1, %s2712_s21   ;;  %s355_s25 = sadd.s32 1, %s2708_s20 }
   0xc   : > { %s352_s26 = ssub.s32 %s2712_s21, %s2836_s24  ;;  %p365_p0 = scmp.ne.s32.totalorder %s2708_s20, %s2704_s19 }
   0xd   : > { %p353_p1 = scmp.eq.s32.totalorder %s352_s26, 0  ;;  %p366_p2 = scmp.eq.s32.totalorder %s2832_s22, 1 }
   0xe   : > { %p371_p3 = scmp.ne.s32.totalorder %s2704_s19, %s2700_s18  ;;  %p372_p4 = scmp.eq.s32.totalorder %s2231_s23, 1 }
   0xf   : > { %s2847_s27 = scalar_select %p353_p1, %s2708_s20, %s355_s25  }
  0x10   : > { %p2849_p5 = por %p366_p2, %p365_p0  ;;  %p2853_p6 = por %p372_p4, %p371_p3 }
  0x11   : > { %p2234_p7 = scmp.ge.s32.totalorder %s2712_s21, 1  ;;  %p439_p8 = scmp.lt.s32.totalorder %s2712_s21, 3 }
  0x13   : > { %p440_p9 = pnand %p2234_p7, %p439_p8 }
  0x14   : > { %p486_p10 = scmp.lt.s32.totalorder (!%p440_p9), %s2832_s22, 1  ;;  %s3291_s0 = sld [smem:[#allocation5_spill]] (!%p440_p9) }
  0x15   : > { %443 = sbr.rel (%p440_p9) target bundleno = 5484 (0x156c), region = 80  ;;  %s3292_s1 = sld [smem:[#allocation6_spill]] (!%p440_p9) }
  0x16   : > { %s3293_s5 = sld [smem:[#allocation10_spill]] (!%p440_p9)  ;;  %s3269_s23 = smov (!%p440_p9), 120  }
  0x17   : > { %s3294_s2 = sld [smem:[#allocation7_spill]] (!%p440_p9)  ;;  %s3279_s26 = smov (!%p440_p9), 88  }
  0x18   : > { %s3271_s17 = smov (!%p440_p9), 72   ;;  %s3295_s3 = sld [smem:[#allocation8_spill]] (!%p440_p9) }
  0x19   : > { %s3296_s4 = sld [smem:[#allocation9_spill]] (!%p440_p9) }
  0x1a   : > { %s487_s30 = scalar_select %p486_p10, %s2832_s22, 1  ;;  %vm494_vm0 = vcmask 261120   ;;  %v2714_v8 = vmov 0.0   ;;  %vm2715_vm1 = vmmov 0   ;;  %v2892_v16 = vld [vmem:[%s3259_s6] ss:$0 sm:$0xff] }
  0x1b   : > { %v2588_v7 = vld [vmem:[%s3292_s1 + $0x8] sm:$0xff]   ;;  %2365 = vmatprep.subr.bf16.mxu1 %v2714_v8  ;;  %2369 = vmatprep.mubr.msk.bf16.mxu1 %vm2715_vm1, %v2714_v8  ;;  %v2589_v9 = vld [vmem:[%s3292_s1] sm:$0xff]   ;;  %vm594_vm2 = vcmask 64512   ;;  %vm658_vm3 = vcmask 1043456   ;;  %vm1045_vm4 = vcmask 130048   ;;  %vm1047_vm5 = vcmask 195584  }
  0x1c   : > { %s2236_s16 = sshll.u32 %s487_s30, 3  ;;  %2366 = vmatpush3.bf16.msra.mxu1 %v2588_v7  ;;  %2379 = vmatprep.subr.bf16.mxu0 %v2714_v8  ;;  %v2887_v14 = vld [vmem:[%s3293_s5] ss:$0 sm:$0xff]  ;;  %s3277_s30 = smov 80   ;;  %vm1254_vm6 = vcmask 523264  }
  0x1d   : > { %s489_s25 = scalar_lea.vmem %s3291_s0, %s2236_s16  ;;  %2367 = vmatprep.subr.bf16.mxu1 %v2714_v8  ;;  %2381 = vmatprep.mubr.msk.bf16.mxu0 %vm2715_vm1, %v2714_v8  ;;  %v2902_v20 = vld [vmem:[%s3294_s2] ss:$0 sm:$0xff]  ;;  %s3272_s16 = smov 112  }
  0x1e   : > { %v2864_v0 = vld [vmem:[%s489_s25] sm:$0xff]  ;;  %s3278_s25 = smov 96   ;;  %s3297_s0 = smov 88  }
  0x1f   : > { %v495_v1 = vsel %vm494_vm0, %v2864_v0, 0.0  ;;  %s3298_s2 = smov 96  }
  0x20   : > { %496 = vadd.xlane.f32.xlu0 %v495_v1  ;;  %2368 = vmatpush3.bf16.msra.mxu1 %v2589_v9 }
  0x21   : > { %2373 = vmatprep.subr.bf16.mxu1 %v2714_v8 }
  0xa9   : > { %v497_v2 = vpop.xlane.xlu0 %496 }
  0xaa   : > { %v499_v3 = vmul.f32 0.03125, %v497_v2 }
  0xac   : > { %v500_v4 = vsub.f32 %v2864_v0, %v499_v3 }
  0xae   : > { %v501_v5 = vmul.f32 %v500_v4, %v500_v4 }
  0xb0   : > { %v502_v6 = vsel %vm494_vm0, %v501_v5, 0.0 }
  0xb1   : > { %503 = vadd.xlane.f32.xlu0 %v502_v6 }
 0x13a   : > { %v504_v10 = vpop.xlane.xlu0 %503 }
 0x13b   : > { %v505_v11 = vmul.f32 0.03125, %v504_v10 }
 0x13d   : > { %v506_v12 = vadd.f32 1e-06, %v505_v11 }
 0x13f   : > { %2608 = vrsqrt.f32 %v506_v12 }
 0x14c   : > { %v2609_v13 = vpop.eup %2608 }
 0x14d   : > { %v508_v15 = vmul.f32 %v2609_v13, %v500_v4 }
 0x14f   : > { %v515_v17 = vmul.f32 %v2887_v14, %v508_v15 }
 0x151   : > { %v522_v18 = vadd.f32 %v2892_v16, %v515_v17 }
 0x153   : > { %v523_v19 = vpack.c.bf16 %v522_v18, %v522_v18 }
 0x155   : > { %2370 = vmatmul.mubr.msk.bf16.vlgmr.msra.gmra.mxu1 %vm494_vm0, %v523_v19 }
 0x156   : > { %2375 = vmatprep.mubr.msk.bf16.mxu1 %vm2715_vm1, %v2714_v8 }
 0x215   : > { %v584_v21 = vpop.f32.mrf.mxu1 }
 0x216   : > { %v585_v22 = vadd.f32 %v2902_v20, %v584_v21 }
 0x217   : > { %v2371_v23 = vpop.f32.mrf.mxu1 }
 0x218   : > { %v2905_v24 = vpack.c.bf16 %v585_v22, %v585_v22 }
 0x219   : > { %v587_v25 = vpop.f32.mrf.mxu1 }
 0x21a   : > { %702 = vrot.lane.b32.xlu0 %v2905_v24, %s3269_s23  ;;  %592 = vrot.lane.b32.xlu1 %v2905_v24, %s3278_s25  ;;  %s3270_s23 = smov 104   ;;  %s3299_s25 = smov 120  }
 0x21b   : > { %v2372_v26 = vpop.f32.mrf.mxu1 }
 0x21e   : > { %704 = vrot.lane.b32.xlu1 %v2905_v24, %s3279_s26  ;;  %s3281_s26 = smov 16  }
 0x222   : > { %814 = vrot.lane.b32.xlu1 %v2905_v24, %s3277_s30  ;;  %s3300_s30 = smov 80  }
 0x226   : > { %812 = vrot.lane.b32.xlu1 %v2905_v24, %s3272_s16  ;;  %s3275_s16 = smov 48  }
 0x22a   : > { %924 = vrot.lane.b32.xlu1 %v2905_v24, %s3271_s17  ;;  %s3276_s17 = smov 56  }
 0x22e   : > { %922 = vrot.lane.b32.xlu1 %v2905_v24, %s3270_s23  ;;  %s3273_s23 = smov 64  }
 0x28c   : > { %v593_v27 = vpop.permute.xlu1 %592  ;;  %v703_v32 = vpop.permute.xlu0 %702 }
 0x28d   : > { %v599_v28 = vsel %vm594_vm2, %v593_v27, 0 }
 0x28e   : > { %2374 = vmatpush3.bf16.xpose.msra.mxu1 %v599_v28 }
 0x28f   : > { %2385 = vmatprep.subr.bf16.mxu1 %v2714_v8 }
 0x290   : > { %v705_v29 = vpop.permute.xlu1 %704 }
 0x291   : > { %v710_v30 = vsel %vm594_vm2, %v705_v29, 0 }
 0x294   : > { %v815_v31 = vpop.permute.xlu1 %814 }
 0x295   : > { %2376 = vmatmul.mubr.msk.bf16.vlgmr.msra.gmra.mxu1 %vm594_vm2, %v2905_v24  ;;  %v820_v34 = vsel %vm594_vm2, %v815_v31, 0 }
 0x296   : > { %2386 = vmatpush3.bf16.xpose.msra.mxu1 %v710_v30  ;;  %2387 = vmatprep.mubr.msk.bf16.mxu1 %vm2715_vm1, %v2714_v8 }
 0x297   : > { %2397 = vmatprep.subr.bf16.mxu1 %v2714_v8 }
 0x298   : > { %v813_v33 = vpop.permute.xlu1 %812 }
 0x29c   : > { %v925_v35 = vpop.permute.xlu1 %924 }
 0x29d   : > { %2388 = vmatmul.mubr.msk.bf16.vlgmr.msra.gmra.mxu1 %vm594_vm2, %v703_v32  ;;  %v930_v36 = vsel %vm594_vm2, %v925_v35, 0 }
 0x29e   : > { %2398 = vmatpush3.bf16.xpose.msra.mxu1 %v820_v34  ;;  %2399 = vmatprep.mubr.msk.bf16.mxu1 %vm2715_vm1, %v2714_v8 }
 0x29f   : > { %2409 = vmatprep.subr.bf16.mxu1 %v2714_v8 }
 0x2a0   : > { %v923_v37 = vpop.permute.xlu1 %922 }
 0x2a5   : > { %2400 = vmatmul.mubr.msk.bf16.vlgmr.msra.gmra.mxu1 %vm594_vm2, %v813_v33 }
 0x2a6   : > { %2410 = vmatpush3.bf16.xpose.msra.mxu1 %v930_v36  ;;  %2411 = vmatprep.mubr.msk.bf16.mxu1 %vm2715_vm1, %v2714_v8 }
 0x2a7   : > { %2421 = vmatprep.subr.bf16.mxu1 %v2714_v8 }
 0x2ad   : > { %2412 = vmatmul.mubr.msk.bf16.vlgmr.msra.gmra.mxu1 %vm594_vm2, %v923_v37 }
 0x2ae   : > { %2425 = vmatprep.mubr.msk.bf16.mxu1 %vm2715_vm1, %v2714_v8 }
 0x355   : > { %v635_v38 = vpop.f32.mrf.mxu1 }
 0x356   : > { %v641_v39 = vsel %vm594_vm2, %v635_v38, -inf }
 0x357   : > { %642 = vmax.xlane.f32.xlu1 %v641_v39  ;;  %v2377_v40 = vpop.f32.mrf.mxu1 }
 0x359   : > { %v638_v41 = vpop.f32.mrf.mxu1 }
 0x35b   : > { %v2378_v42 = vpop.f32.mrf.mxu1 }
 0x35d   : > { %v746_v43 = vpop.f32.mrf.mxu1 }
 0x35e   : > { %v752_v44 = vsel %vm594_vm2, %v746_v43, -inf }
 0x35f   : > { %753 = vmax.xlane.f32.xlu0 %v752_v44  ;;  %v2389_v45 = vpop.f32.mrf.mxu1 }
 0x361   : > { %v749_v46 = vpop.f32.mrf.mxu1 }
 0x363   : > { %v2390_v47 = vpop.f32.mrf.mxu1 }
 0x365   : > { %v856_v48 = vpop.f32.mrf.mxu1 }
 0x366   : > { %v862_v49 = vsel %vm594_vm2, %v856_v48, -inf }
 0x367   : > { %863 = vmax.xlane.f32.xlu1 %v862_v49  ;;  %v2401_v50 = vpop.f32.mrf.mxu1 }
 0x369   : > { %v859_v51 = vpop.f32.mrf.mxu1 }
 0x36a   : > { %v2590_v51 = vld [vmem:[%s3295_s3 + $0x8] sm:$0xff]  }
 0x36b   : > { %v2402_v52 = vpop.f32.mrf.mxu1  ;;  %2422 = vmatpush3.bf16.msra.mxu1 %v2590_v51 }
 0x36c   : > { %2423 = vmatprep.subr.bf16.mxu1 %v2714_v8  ;;  %v2591_v52 = vld [vmem:[%s3295_s3] sm:$0xff]  }
 0x36d   : > { %v966_v53 = vpop.f32.mrf.mxu1 }
 0x36e   : > { %v972_v54 = vsel %vm594_vm2, %v966_v53, -inf }
 0x36f   : > { %973 = vmax.xlane.f32.xlu0 %v972_v54  ;;  %v2413_v55 = vpop.f32.mrf.mxu1  ;;  %2424 = vmatpush3.bf16.msra.mxu1 %v2591_v52 }
 0x370   : > { %2437 = vmatprep.subr.bf16.mxu1 %v2714_v8 }
 0x371   : > { %v969_v56 = vpop.f32.mrf.mxu1 }
 0x373   : > { %v2414_v57 = vpop.f32.mrf.mxu1 }
 0x3e0   : > { %v643_v58 = vpop.xlane.xlu1 %642 }
 0x3e1   : > { %v644_v59 = vsub.f32 %v635_v38, %v643_v58 }
 0x3e3   : > { %v645_v60 = vmul.f32 1.442695, %v644_v59 }
 0x3e5   : > { %2610 = vpow2.f32 %v645_v60 }
 0x3e8   : > { %v754_v61 = vpop.xlane.xlu0 %753 }
 0x3e9   : > { %v755_v62 = vsub.f32 %v746_v43, %v754_v61 }
 0x3eb   : > { %v756_v63 = vmul.f32 1.442695, %v755_v62 }
 0x3ed   : > { %2612 = vpow2.f32 %v756_v63 }
 0x3f0   : > { %v864_v11 = vpop.xlane.xlu1 %863 }
 0x3f1   : > { %v865_v12 = vsub.f32 %v856_v48, %v864_v11 }
 0x3f2   : > { %v2611_v1 = vpop.eup %2610 }
 0x3f3   : > { %v647_v2 = vsel %vm594_vm2, %v2611_v1, 0.0  ;;  %v866_v13 = vmul.f32 1.442695, %v865_v12 }
 0x3f4   : > { %648 = vadd.xlane.f32.xlu1 %v647_v2 }
 0x3f8   : > { %v974_v3 = vpop.xlane.xlu0 %973 }
 0x3f9   : > { %v975_v4 = vsub.f32 %v966_v53, %v974_v3 }
 0x3fa   : > { %v2613_v5 = vpop.eup %2612 }
 0x3fb   : > { %v976_v6 = vmul.f32 1.442695, %v975_v4  ;;  %v758_v7 = vsel %vm594_vm2, %v2613_v5, 0.0 }
 0x3fc   : > { %759 = vadd.xlane.f32.xlu0 %v758_v7 }
 0x3fd   : > { %2614 = vpow2.f32 %v976_v6 }
 0x3fe   : > { %2616 = vpow2.f32 %v866_v13 }
 0x405   : > { %653 = vrot.lane.b32.xlu1 %v2905_v24, %s3273_s23  ;;  %s3274_s23 = smov 40  }
 0x40a   : > { %v2615_v9 = vpop.eup %2614 }
 0x40b   : > { %v978_v10 = vsel %vm594_vm2, %v2615_v9, 0.0  ;;  %v2617_v15 = vpop.eup %2616 }
 0x40c   : > { %979 = vadd.xlane.f32.xlu0 %v978_v10  ;;  %v868_v17 = vsel %vm594_vm2, %v2617_v15, 0.0 }
 0x422   : > { %764 = vrot.lane.b32.xlu0 %v2905_v24, %s3276_s17  ;;  %s3302_s17 = smov 72  }
 0x429   : > { %869 = vadd.xlane.f32.xlu1 %v868_v17 }
 0x43a   : > { %874 = vrot.lane.b32.xlu1 %v2905_v24, %s3275_s16  ;;  %s3280_s16 = smov 24  }
 0x43e   : > { %984 = vrot.lane.b32.xlu1 %v2905_v24, %s3274_s23  ;;  %s3282_s23 = smov 8  }
 0x47d   : > { %v649_v18 = vpop.xlane.xlu1 %648 }
 0x47e   : > { %2618 = vrcp.f32 %v649_v18 }
 0x481   : > { %v654_v19 = vpop.permute.xlu1 %653 }
 0x482   : > { %v660_v21 = vsel %vm658_vm3, %v654_v19, 0 }
 0x483   : > { %2380 = vmatpush3.bf16.msra.mxu0 %v660_v21 }
 0x484   : > { %2391 = vmatprep.subr.bf16.mxu0 %v2714_v8 }
 0x485   : > { %v760_v22 = vpop.xlane.xlu0 %759 }
 0x486   : > { %2620 = vrcp.f32 %v760_v22  ;;  %v2592_v22 = vld [vmem:[%s3262_s9 + $0x8] sm:$0xff]  }
 0x48b   : > { %v2619_v23 = vpop.eup %2618 }
 0x48c   : > { %v651_v25 = vmul.f32 %v2619_v23, %v2611_v1  ;;  %v2594_v23 = vld [vmem:[%s3264_s11 + $0x18] sm:$0xff]  }
 0x48e   : > { %v652_v26 = vpack.c.bf16 %v651_v25, %v651_v25  ;;  %v2595_v25 = vld [vmem:[%s3264_s11 + $0x10] sm:$0xff]  }
 0x490   : > { %2382 = vmatmul.mubr.msk.bf16.vlgmr.msra.gmra.mxu0 %vm594_vm2, %v652_v26 }
 0x491   : > { %2393 = vmatprep.mubr.msk.bf16.mxu0 %vm2715_vm1, %v2714_v8 }
 0x493   : > { %v2621_v24 = vpop.eup %2620 }
 0x494   : > { %v762_v28 = vmul.f32 %v2621_v24, %v2613_v5  ;;  %v2998_v5 = vld [vmem:[%s3296_s4] ss:$0 sm:$0xff] }
 0x495   : > { %v980_v27 = vpop.xlane.xlu0 %979 }
 0x496   : > { %v763_v31 = vpack.c.bf16 %v762_v28, %v762_v28 }
 0x499   : > { %v765_v29 = vpop.permute.xlu0 %764 }
 0x49a   : > { %v770_v30 = vsel %vm658_vm3, %v765_v29, 0  ;;  %v3023_v29 = vld [vmem:[%s3260_s7] ss:$0 sm:$0xff] }
 0x49b   : > { %2392 = vmatpush3.bf16.msra.mxu0 %v770_v30 }
 0x49c   : > { %2403 = vmatprep.subr.bf16.mxu0 %v2714_v8 }
 0x49e   : > { %2394 = vmatmul.mubr.msk.bf16.vlgmr.msra.gmra.mxu0 %vm594_vm2, %v763_v31  ;;  %v3028_v31 = vld [vmem:[%s3261_s8] ss:$0 sm:$0xff] }
 0x49f   : > { %2405 = vmatprep.mubr.msk.bf16.mxu0 %vm2715_vm1, %v2714_v8 }
 0x4b2   : > { %v870_v32 = vpop.xlane.xlu1 %869 }
 0x4b3   : > { %2622 = vrcp.f32 %v870_v32 }
 0x4b4   : > { %2624 = vrcp.f32 %v980_v27 }
 0x4b6   : > { %v875_v33 = vpop.permute.xlu1 %874 }
 0x4b7   : > { %v880_v34 = vsel %vm658_vm3, %v875_v33, 0 }
 0x4b8   : > { %2404 = vmatpush3.bf16.msra.mxu0 %v880_v34 }
 0x4b9   : > { %2415 = vmatprep.subr.bf16.mxu0 %v2714_v8 }
 0x4ba   : > { %v985_v37 = vpop.permute.xlu1 %984 }
 0x4bb   : > { %v990_v40 = vsel %vm658_vm3, %v985_v37, 0  ;;  %v3046_v37 = vld [vmem:[%s3263_s10] ss:$0 sm:$0xff] }
 0x4c0   : > { %v2623_v35 = vpop.eup %2622 }
 0x4c1   : > { %v872_v36 = vmul.f32 %v2623_v35, %v2617_v15  ;;  %v2625_v39 = vpop.eup %2624  ;;  %v2596_v35 = vld [vmem:[%s3264_s11 + $0x8] sm:$0xff]  }
 0x4c2   : > { %v982_v41 = vmul.f32 %v2625_v39, %v2615_v9 }
 0x4c3   : > { %v873_v38 = vpack.c.bf16 %v872_v36, %v872_v36  ;;  %v2597_v36 = vld [vmem:[%s3264_s11] sm:$0xff]  }
 0x4c4   : > { %v983_v42 = vpack.c.bf16 %v982_v41, %v982_v41 }
 0x4c5   : > { %2406 = vmatmul.mubr.msk.bf16.vlgmr.msra.gmra.mxu0 %vm594_vm2, %v873_v38 }
 0x4c6   : > { %2416 = vmatpush3.bf16.msra.mxu0 %v990_v40  ;;  %2417 = vmatprep.mubr.msk.bf16.mxu0 %vm2715_vm1, %v2714_v8 }
 0x4c7   : > { %2429 = vmatprep.subr.bf16.mxu0 %v2714_v8 }
 0x4cd   : > { %2418 = vmatmul.mubr.msk.bf16.vlgmr.msra.gmra.mxu0 %vm594_vm2, %v983_v42 }
 0x4ce   : > { %2433 = vmatprep.mubr.msk.bf16.mxu0 %vm2715_vm1, %v2714_v8  ;;  %2430 = vmatpush3.bf16.msra.mxu0 %v2592_v22 }
 0x4cf   : > { %2431 = vmatprep.subr.bf16.mxu0 %v2714_v8 }
 0x550   : > { %v696_v43 = vpop.f32.mrf.mxu0 }
 0x552   : > { %v2383_v44 = vpop.f32.mrf.mxu0 }
 0x554   : > { %v699_v45 = vpop.f32.mrf.mxu0 }
 0x555   : > { %v3055_v45 = vld [vmem:[%s3265_s12] ss:$0 sm:$0xff] }
 0x556   : > { %v2384_v46 = vpop.f32.mrf.mxu0 }
 0x55e   : > { %v806_v47 = vpop.f32.mrf.mxu0 }
 0x55f   : > { %1033 = vrot.lane.b32.xlu0 %v806_v47, %s3282_s23  ;;  %s3303_s23 = smov 104  }
 0x560   : > { %v2395_v48 = vpop.f32.mrf.mxu0 }
 0x562   : > { %v809_v49 = vpop.f32.mrf.mxu0 }
 0x564   : > { %v2396_v50 = vpop.f32.mrf.mxu0 }
 0x585   : > { %v916_v53 = vpop.f32.mrf.mxu0 }
 0x586   : > { %1037 = vrot.lane.b32.xlu1 %v916_v53, %s3281_s26  ;;  %s3304_s26 = smov 64  }
 0x587   : > { %v2407_v54 = vpop.f32.mrf.mxu0 }
 0x589   : > { %v919_v55 = vpop.f32.mrf.mxu0 }
 0x58b   : > { %v2408_v56 = vpop.f32.mrf.mxu0 }
 0x58d   : > { %v1026_v57 = vpop.f32.mrf.mxu0 }
 0x58e   : > { %1041 = vrot.lane.b32.xlu0 %v1026_v57, %s3280_s16  ;;  %s3301_s16 = smov 112  }
 0x58f   : > { %v2419_v58 = vpop.f32.mrf.mxu0 }
 0x591   : > { %v1029_v59 = vpop.f32.mrf.mxu0 }
 0x593   : > { %v2420_v60 = vpop.f32.mrf.mxu0 }
 0x5d1   : > { %v1034_v61 = vpop.permute.xlu0 %1033 }
 0x5d2   : > { %v1044_v63 = vsel %vm594_vm2, %v696_v43, %v1034_v61 }
 0x5f8   : > { %v1038_v62 = vpop.permute.xlu1 %1037 }
 0x5f9   : > { %v1046_v1 = vsel %vm1045_vm4, %v1044_v63, %v1038_v62  ;;  %v3063_v62 = vld [vmem:[%s3266_s13] ss:$0 sm:$0xff] }
 0x600   : > { %v1042_v2 = vpop.permute.xlu0 %1041 }
 0x601   : > { %v1048_v3 = vsel %vm1047_vm5, %v1046_v1, %v1042_v2  ;;  %v3068_v1 = vld [vmem:[%s3267_s14] ss:$0 sm:$0xff] }
 0x602   : > { %v1049_v4 = vpack.c.bf16 %v1048_v3, %v1048_v3 }
 0x604   : > { %2426 = vmatmul.mubr.msk.bf16.vlgmr.msra.gmra.mxu1 %vm494_vm0, %v1049_v4 }
 0x605   : > { %2445 = vmatprep.mubr.msk.bf16.mxu1 %vm2715_vm1, %v2714_v8  ;;  %2438 = vmatpush3.bf16.msra.mxu1 %v2594_v23 }
 0x606   : > { %2439 = vmatprep.subr.bf16.mxu1 %v2714_v8 }
 0x609   : > { %2440 = vmatpush3.bf16.msra.mxu1 %v2595_v25 }
 0x60a   : > { %2441 = vmatprep.subr.bf16.mxu1 %v2714_v8 }
 0x60d   : > { %2442 = vmatpush3.bf16.msra.mxu1 %v2596_v35 }
 0x60e   : > { %2443 = vmatprep.subr.bf16.mxu1 %v2714_v8 }
 0x611   : > { %2444 = vmatpush3.bf16.msra.mxu1 %v2597_v36 }
 0x612   : > { %2463 = vmatprep.subr.bf16.mxu1 %v2714_v8 }
 0x6c4   : > { %v1110_v6 = vpop.f32.mrf.mxu1 }
 0x6c5   : > { %v1111_v7 = vadd.f32 %v2998_v5, %v1110_v6 }
 0x6c6   : > { %v2427_v9 = vpop.f32.mrf.mxu1 }
 0x6c7   : > { %v1116_v10 = vadd.f32 %v1111_v7, %v2864_v0  ;;  %v2593_v0 = vld [vmem:[%s3262_s9] sm:$0xff]  }
 0x6c8   : > { %v1113_v11 = vpop.f32.mrf.mxu1  ;;  %2432 = vmatpush3.bf16.msra.mxu0 %v2593_v0 }
 0x6c9   : > { %v1119_v12 = vsel %vm494_vm0, %v1116_v10, 0.0  ;;  %2449 = vmatprep.subr.bf16.mxu0 %v2714_v8 }
 0x6ca   : > { %1120 = vadd.xlane.f32.xlu1 %v1119_v12  ;;  %v2428_v13 = vpop.f32.mrf.mxu1  ;;  %v2598_v12 = vld [vmem:[%s3292_s1 + $0x8] sm:$0xff]  }
 0x6cb   : > { %v2599_v13 = vld [vmem:[%s3292_s1] sm:$0xff]  }
 0x753   : > { %v1121_v15 = vpop.xlane.xlu1 %1120 }
 0x754   : > { %v1122_v17 = vmul.f32 0.03125, %v1121_v15 }
 0x756   : > { %v1123_v18 = vsub.f32 %v1116_v10, %v1122_v17 }
 0x758   : > { %v1124_v19 = vmul.f32 %v1123_v18, %v1123_v18 }
 0x75a   : > { %v1125_v21 = vsel %vm494_vm0, %v1124_v19, 0.0 }
 0x75b   : > { %1126 = vadd.xlane.f32.xlu0 %v1125_v21 }
 0x7e4   : > { %v1127_v26 = vpop.xlane.xlu0 %1126 }
 0x7e5   : > { %v1128_v24 = vmul.f32 0.03125, %v1127_v26 }
 0x7e7   : > { %v1129_v27 = vadd.f32 1e-06, %v1128_v24 }
 0x7e9   : > { %2626 = vrsqrt.f32 %v1129_v27 }
 0x7f6   : > { %v2627_v28 = vpop.eup %2626 }
 0x7f7   : > { %v1131_v30 = vmul.f32 %v2627_v28, %v1123_v18 }
 0x7f9   : > { %v1138_v32 = vmul.f32 %v3023_v29, %v1131_v30 }
 0x7fb   : > { %v1145_v33 = vadd.f32 %v3028_v31, %v1138_v32 }
 0x7fd   : > { %v1146_v34 = vpack.c.bf16 %v1145_v33, %v1145_v33 }
 0x7ff   : > { %2434 = vmatmul.mubr.msk.bf16.vlgmr.msra.gmra.mxu0 %vm494_vm0, %v1146_v34 }
 0x800   : > { %2453 = vmatprep.mubr.msk.bf16.mxu0 %vm2715_vm1, %v2714_v8  ;;  %2450 = vmatpush3.bf16.msra.mxu0 %v2598_v12 }
 0x801   : > { %2451 = vmatprep.subr.bf16.mxu0 %v2714_v8 }
 0x804   : > { %2452 = vmatpush3.bf16.msra.mxu0 %v2599_v13 }
 0x805   : > { %2457 = vmatprep.subr.bf16.mxu0 %v2714_v8 }
 0x8bf   : > { %v1207_v38 = vpop.f32.mrf.mxu0 }
 0x8c0   : > { %v1208_v39 = vadd.f32 %v3046_v37, %v1207_v38 }
 0x8c1   : > { %v2435_v40 = vpop.f32.mrf.mxu0 }
 0x8c2   : > { %v1213_v41 = vmax.f32 %v1208_v39, 0.0 }
 0x8c3   : > { %v1210_v42 = vpop.f32.mrf.mxu0 }
 0x8c4   : > { %v1214_v43 = vpack.c.bf16 %v1213_v41, %v1213_v41 }
 0x8c5   : > { %v2436_v44 = vpop.f32.mrf.mxu0 }
 0x8c6   : > { %2446 = vmatmul.mubr.msk.bf16.vlgmr.msra.gmra.mxu1 %vm1254_vm6, %v1214_v43 }
 0x8c7   : > { %2465 = vmatprep.mubr.msk.bf16.mxu1 %vm2715_vm1, %v2714_v8 }
 0x986   : > { %v1292_v46 = vpop.f32.mrf.mxu1 }
 0x987   : > { %v1293_v47 = vadd.f32 %v3055_v45, %v1292_v46 }
 0x988   : > { %v2447_v48 = vpop.f32.mrf.mxu1 }
 0x989   : > { %v1298_v49 = vadd.f32 %v1293_v47, %v1116_v10 }
 0x98a   : > { %v1295_v50 = vpop.f32.mrf.mxu1 }
 0x98b   : > { %v1301_v51 = vsel %vm494_vm0, %v1298_v49, 0.0 }
 0x98c   : > { %1302 = vadd.xlane.f32.xlu0 %v1301_v51  ;;  %v2448_v52 = vpop.f32.mrf.mxu1 }
 0xa15   : > { %v1303_v53 = vpop.xlane.xlu0 %1302 }
 0xa16   : > { %v1304_v54 = vmul.f32 0.03125, %v1303_v53 }
 0xa18   : > { %v1305_v55 = vsub.f32 %v1298_v49, %v1304_v54 }
 0xa1a   : > { %v1306_v56 = vmul.f32 %v1305_v55, %v1305_v55 }
 0xa1c   : > { %v1307_v57 = vsel %vm494_vm0, %v1306_v56, 0.0 }
 0xa1d   : > { %1308 = vadd.xlane.f32.xlu1 %v1307_v57 }
 0xaa6   : > { %v1309_v58 = vpop.xlane.xlu1 %1308 }
 0xaa7   : > { %v1310_v59 = vmul.f32 0.03125, %v1309_v58 }
 0xaa9   : > { %v1311_v60 = vadd.f32 1e-06, %v1310_v59 }
 0xaab   : > { %2628 = vrsqrt.f32 %v1311_v60 }
 0xab8   : > { %v2629_v61 = vpop.eup %2628 }
 0xab9   : > { %v1313_v63 = vmul.f32 %v2629_v61, %v1305_v55 }
 0xabb   : > { %v1320_v2 = vmul.f32 %v3063_v62, %v1313_v63 }
 0xabd   : > { %v3072_v3 = vadd.f32 %v3068_v1, %v1320_v2 }
 0xabf   : > { %v1330_v4 = vsel %vm494_vm0, %v3072_v3, 0.0 }
 0xac0   : > { %1331 = vadd.xlane.f32.xlu0 %v1330_v4 }
 0xb49   : > { %v1332_v6 = vpop.xlane.xlu0 %1331 }
 0xb4a   : > { %v1333_v7 = vmul.f32 0.03125, %v1332_v6 }
 0xb4c   : > { %v1334_v9 = vsub.f32 %v3072_v3, %v1333_v7 }
 0xb4e   : > { %v1335_v10 = vmul.f32 %v1334_v9, %v1334_v9 }
 0xb50   : > { %v1336_v11 = vsel %vm494_vm0, %v1335_v10, 0.0 }
 0xb51   : > { %1337 = vadd.xlane.f32.xlu1 %v1336_v11 }
 0xbda   : > { %v1338_v15 = vpop.xlane.xlu1 %1337 }
 0xbdb   : > { %v1339_v17 = vmul.f32 0.03125, %v1338_v15 }
 0xbdd   : > { %v1340_v18 = vadd.f32 1e-06, %v1339_v17 }
 0xbdf   : > { %2630 = vrsqrt.f32 %v1340_v18 }
 0xbec   : > { %v2631_v19 = vpop.eup %2630 }
 0xbed   : > { %v1342_v21 = vmul.f32 %v2631_v19, %v1334_v9 }
 0xbef   : > { %v1349_v22 = vmul.f32 %v2887_v14, %v1342_v21 }
 0xbf1   : > { %v1356_v0 = vadd.f32 %v2892_v16, %v1349_v22 }
 0xbf3   : > { %v1357_v23 = vpack.c.bf16 %v1356_v0, %v1356_v0 }
 0xbf5   : > { %2454 = vmatmul.mubr.msk.bf16.vlgmr.msra.gmra.mxu0 %vm494_vm0, %v1357_v23 }
 0xbf6   : > { %2459 = vmatprep.mubr.msk.bf16.mxu0 %vm2715_vm1, %v2714_v8 }
 0xcb5   : > { %v1418_v25 = vpop.f32.mrf.mxu0 }
 0xcb6   : > { %v1419_v26 = vadd.f32 %v2902_v20, %v1418_v25 }
 0xcb7   : > { %v2455_v24 = vpop.f32.mrf.mxu0 }
 0xcb8   : > { %v3092_v27 = vpack.c.bf16 %v1419_v26, %v1419_v26 }
 0xcb9   : > { %v1421_v28 = vpop.f32.mrf.mxu0 }
 0xcba   : > { %1536 = vrot.lane.b32.xlu1 %v3092_v27, %s3297_s0  ;;  %1426 = vrot.lane.b32.xlu0 %v3092_v27, %s3298_s2  ;;  %s3305_s0 = smov 56   ;;  %s3306_s2 = smov 48  }
 0xcbb   : > { %v2456_v14 = vpop.f32.mrf.mxu0 }
 0xcbe   : > { %1534 = vrot.lane.b32.xlu1 %v3092_v27, %s3299_s25  ;;  %1646 = vrot.lane.b32.xlu0 %v3092_v27, %s3300_s30  ;;  %s3307_s25 = smov 40   ;;  %s3308_s30 = smov 8  }
 0xcc2   : > { %1644 = vrot.lane.b32.xlu1 %v3092_v27, %s3301_s16  ;;  %1756 = vrot.lane.b32.xlu0 %v3092_v27, %s3302_s17 }
 0xcc6   : > { %1754 = vrot.lane.b32.xlu1 %v3092_v27, %s3303_s23  ;;  %s483_s23 = sand.u32 1, %s2704_s19  }
 0xcc7   : > { %s2159_s1 = scalar_lea.sflag [#allocation3], %s483_s23 }
 0xd2c   : > { %v1427_v16 = vpop.permute.xlu0 %1426  ;;  %v1537_v30 = vpop.permute.xlu1 %1536 }
 0xd2d   : > { %v1432_v20 = vsel %vm594_vm2, %v1427_v16, 0  ;;  %v1542_v32 = vsel %vm594_vm2, %v1537_v30, 0 }
 0xd2e   : > { %2458 = vmatpush3.bf16.xpose.msra.mxu0 %v1432_v20 }
 0xd2f   : > { %2469 = vmatprep.subr.bf16.mxu0 %v2714_v8 }
 0xd30   : > { %v1647_v33 = vpop.permute.xlu0 %1646  ;;  %v1535_v34 = vpop.permute.xlu1 %1534 }
 0xd31   : > { %v1652_v35 = vsel %vm594_vm2, %v1647_v33, 0 }
 0xd34   : > { %v1757_v36 = vpop.permute.xlu0 %1756  ;;  %v1645_v38 = vpop.permute.xlu1 %1644 }
 0xd35   : > { %2460 = vmatmul.mubr.msk.bf16.vlgmr.msra.gmra.mxu0 %vm594_vm2, %v3092_v27  ;;  %v1762_v39 = vsel %vm594_vm2, %v1757_v36, 0 }
 0xd36   : > { %2470 = vmatpush3.bf16.xpose.msra.mxu0 %v1542_v32  ;;  %2471 = vmatprep.mubr.msk.bf16.mxu0 %vm2715_vm1, %v2714_v8 }
 0xd37   : > { %2481 = vmatprep.subr.bf16.mxu0 %v2714_v8 }
 0xd38   : > { %v1755_v40 = vpop.permute.xlu1 %1754 }
 0xd3d   : > { %2472 = vmatmul.mubr.msk.bf16.vlgmr.msra.gmra.mxu0 %vm594_vm2, %v1535_v34 }
 0xd3e   : > { %2482 = vmatpush3.bf16.xpose.msra.mxu0 %v1652_v35  ;;  %2483 = vmatprep.mubr.msk.bf16.mxu0 %vm2715_vm1, %v2714_v8 }
 0xd3f   : > { %2493 = vmatprep.subr.bf16.mxu0 %v2714_v8 }
 0xd45   : > { %2484 = vmatmul.mubr.msk.bf16.vlgmr.msra.gmra.mxu0 %vm594_vm2, %v1645_v38 }
 0xd46   : > { %2494 = vmatpush3.bf16.xpose.msra.mxu0 %v1762_v39  ;;  %2495 = vmatprep.mubr.msk.bf16.mxu0 %vm2715_vm1, %v2714_v8 }
 0xd47   : > { %2505 = vmatprep.subr.bf16.mxu0 %v2714_v8 }
 0xd4d   : > { %2496 = vmatmul.mubr.msk.bf16.vlgmr.msra.gmra.mxu0 %vm594_vm2, %v1755_v40 }
 0xd4e   : > { %2509 = vmatprep.mubr.msk.bf16.mxu0 %vm2715_vm1, %v2714_v8 }
 0xdf5   : > { %v1468_v41 = vpop.f32.mrf.mxu0 }
 0xdf6   : > { %v1474_v42 = vsel %vm594_vm2, %v1468_v41, -inf }
 0xdf7   : > { %1475 = vmax.xlane.f32.xlu0 %v1474_v42  ;;  %v2461_v43 = vpop.f32.mrf.mxu0 }
 0xdf9   : > { %v1471_v44 = vpop.f32.mrf.mxu0 }
 0xdfb   : > { %v2462_v46 = vpop.f32.mrf.mxu0 }
 0xdfd   : > { %v1578_v47 = vpop.f32.mrf.mxu0 }
 0xdfe   : > { %v1584_v48 = vsel %vm594_vm2, %v1578_v47, -inf }
 0xdff   : > { %1585 = vmax.xlane.f32.xlu1 %v1584_v48  ;;  %v2473_v49 = vpop.f32.mrf.mxu0 }
 0xe01   : > { %v1581_v50 = vpop.f32.mrf.mxu0 }
 0xe03   : > { %v2474_v51 = vpop.f32.mrf.mxu0 }
 0xe05   : > { %v1688_v52 = vpop.f32.mrf.mxu0 }
 0xe06   : > { %v1694_v53 = vsel %vm594_vm2, %v1688_v52, -inf }
 0xe07   : > { %1695 = vmax.xlane.f32.xlu0 %v1694_v53  ;;  %v2485_v54 = vpop.f32.mrf.mxu0 }
 0xe09   : > { %v1691_v55 = vpop.f32.mrf.mxu0 }
 0xe0b   : > { %v2486_v56 = vpop.f32.mrf.mxu0 }
 0xe0d   : > { %v1798_v57 = vpop.f32.mrf.mxu0 }
 0xe0e   : > { %v1804_v58 = vsel %vm594_vm2, %v1798_v57, -inf }
 0xe0f   : > { %1805 = vmax.xlane.f32.xlu0 %v1804_v58  ;;  %v2497_v59 = vpop.f32.mrf.mxu0 }
 0xe10   : > { %v2600_v59 = vld [vmem:[%s3295_s3 + $0x8] sm:$0xff]  }
 0xe11   : > { %v1801_v60 = vpop.f32.mrf.mxu0  ;;  %2506 = vmatpush3.bf16.msra.mxu0 %v2600_v59 }
 0xe12   : > { %2507 = vmatprep.subr.bf16.mxu0 %v2714_v8  ;;  %v2601_v60 = vld [vmem:[%s3295_s3] sm:$0xff]  }
 0xe13   : > { %v2498_v61 = vpop.f32.mrf.mxu0 }
 0xe15   : > { %2508 = vmatpush3.bf16.msra.mxu0 %v2601_v60 }
 0xe16   : > { %2521 = vmatprep.subr.bf16.mxu0 %v2714_v8 }
 0xe80   : > { %v1476_v63 = vpop.xlane.xlu0 %1475 }
 0xe81   : > { %v1477_v2 = vsub.f32 %v1468_v41, %v1476_v63 }
 0xe83   : > { %v1478_v4 = vmul.f32 1.442695, %v1477_v2 }
 0xe85   : > { %2632 = vpow2.f32 %v1478_v4 }
 0xe88   : > { %v1586_v6 = vpop.xlane.xlu1 %1585 }
 0xe89   : > { %v1587_v7 = vsub.f32 %v1578_v47, %v1586_v6 }
 0xe8b   : > { %v1588_v9 = vmul.f32 1.442695, %v1587_v7 }
 0xe8d   : > { %2634 = vpow2.f32 %v1588_v9 }
 0xe90   : > { %v1696_v12 = vpop.xlane.xlu0 %1695 }
 0xe91   : > { %v1697_v0 = vsub.f32 %v1688_v52, %v1696_v12 }
 0xe92   : > { %v2633_v10 = vpop.eup %2632 }
 0xe93   : > { %v1480_v11 = vsel %vm594_vm2, %v2633_v10, 0.0  ;;  %v1698_v23 = vmul.f32 1.442695, %v1697_v0 }
 0xe94   : > { %1481 = vadd.xlane.f32.xlu1 %v1480_v11 }
 0xe98   : > { %v1806_v13 = vpop.xlane.xlu0 %1805 }
 0xe99   : > { %v1807_v15 = vsub.f32 %v1798_v57, %v1806_v13 }
 0xe9a   : > { %v2635_v17 = vpop.eup %2634 }
 0xe9b   : > { %v1808_v18 = vmul.f32 1.442695, %v1807_v15  ;;  %v1590_v19 = vsel %vm594_vm2, %v2635_v17, 0.0 }
 0xe9c   : > { %1591 = vadd.xlane.f32.xlu0 %v1590_v19 }
 0xe9d   : > { %2636 = vpow2.f32 %v1808_v18 }
 0xe9e   : > { %2638 = vpow2.f32 %v1698_v23 }
 0xea5   : > { %1486 = vrot.lane.b32.xlu1 %v3092_v27, %s3304_s26  ;;  %s2235_s26 = sshll.u32 %s483_s23, 3 }
 0xeaa   : > { %v2637_v21 = vpop.eup %2636 }
 0xeab   : > { %v1810_v22 = vsel %vm594_vm2, %v2637_v21, 0.0  ;;  %v2639_v25 = vpop.eup %2638 }
 0xeac   : > { %1811 = vadd.xlane.f32.xlu0 %v1810_v22  ;;  %v1700_v26 = vsel %vm594_vm2, %v2639_v25, 0.0 }
 0xec2   : > { %1596 = vrot.lane.b32.xlu0 %v3092_v27, %s3305_s0  ;;  %s3309_s0 = smov 16  }
 0xec9   : > { %1701 = vadd.xlane.f32.xlu1 %v1700_v26 }
 0xeda   : > { %1706 = vrot.lane.b32.xlu1 %v3092_v27, %s3306_s2  ;;  %s3310_s2 = smov 24  }
 0xede   : > { %1816 = vrot.lane.b32.xlu1 %v3092_v27, %s3307_s25 }
 0xf1d   : > { %v1482_v24 = vpop.xlane.xlu1 %1481 }
 0xf1e   : > { %2640 = vrcp.f32 %v1482_v24 }
 0xf21   : > { %v1487_v28 = vpop.permute.xlu1 %1486 }
 0xf22   : > { %v1492_v14 = vsel %vm658_vm3, %v1487_v28, 0 }
 0xf23   : > { %2464 = vmatpush3.bf16.msra.mxu1 %v1492_v14 }
 0xf24   : > { %2475 = vmatprep.subr.bf16.mxu1 %v2714_v8 }
 0xf25   : > { %v1592_v16 = vpop.xlane.xlu0 %1591 }
 0xf26   : > { %2642 = vrcp.f32 %v1592_v16 }
 0xf2b   : > { %v2641_v20 = vpop.eup %2640 }
 0xf2c   : > { %v1484_v30 = vmul.f32 %v2641_v20, %v2633_v10 }
 0xf2e   : > { %v1485_v32 = vpack.c.bf16 %v1484_v30, %v1484_v30 }
 0xf30   : > { %2466 = vmatmul.mubr.msk.bf16.vlgmr.msra.gmra.mxu1 %vm594_vm2, %v1485_v32  ;;  %v2602_v32 = vld [vmem:[%s3262_s9 + $0x8] sm:$0xff]  }
 0xf31   : > { %2477 = vmatprep.mubr.msk.bf16.mxu1 %vm2715_vm1, %v2714_v8 }
 0xf33   : > { %v2643_v33 = vpop.eup %2642 }
 0xf34   : > { %v1594_v34 = vmul.f32 %v2643_v33, %v2635_v17  ;;  %v2605_v33 = vld [vmem:[%s3264_s11 + $0x10] sm:$0xff]  }
 0xf35   : > { %v1812_v27 = vpop.xlane.xlu0 %1811 }
 0xf36   : > { %v1595_v38 = vpack.c.bf16 %v1594_v34, %v1594_v34 }
 0xf39   : > { %v1597_v35 = vpop.permute.xlu0 %1596 }
 0xf3a   : > { %v1602_v36 = vsel %vm658_vm3, %v1597_v35, 0 }
 0xf3b   : > { %2476 = vmatpush3.bf16.msra.mxu1 %v1602_v36 }
 0xf3c   : > { %2487 = vmatprep.subr.bf16.mxu1 %v2714_v8 }
 0xf3e   : > { %2478 = vmatmul.mubr.msk.bf16.vlgmr.msra.gmra.mxu1 %vm594_vm2, %v1595_v38 }
 0xf3f   : > { %2489 = vmatprep.mubr.msk.bf16.mxu1 %vm2715_vm1, %v2714_v8 }
 0xf52   : > { %v1702_v39 = vpop.xlane.xlu1 %1701 }
 0xf53   : > { %2644 = vrcp.f32 %v1702_v39 }
 0xf54   : > { %2646 = vrcp.f32 %v1812_v27 }
 0xf56   : > { %v1707_v40 = vpop.permute.xlu1 %1706 }
 0xf57   : > { %v1712_v41 = vsel %vm658_vm3, %v1707_v40, 0 }
 0xf58   : > { %2488 = vmatpush3.bf16.msra.mxu1 %v1712_v41 }
 0xf59   : > { %2499 = vmatprep.subr.bf16.mxu1 %v2714_v8 }
 0xf5a   : > { %v1817_v44 = vpop.permute.xlu1 %1816 }
 0xf5b   : > { %v1822_v48 = vsel %vm658_vm3, %v1817_v44, 0 }
 0xf60   : > { %v2645_v42 = vpop.eup %2644 }
 0xf61   : > { %v1704_v43 = vmul.f32 %v2645_v42, %v2639_v25  ;;  %v2647_v47 = vpop.eup %2646  ;;  %v2606_v42 = vld [vmem:[%s3264_s11 + $0x8] sm:$0xff]  }
 0xf62   : > { %v1814_v49 = vmul.f32 %v2647_v47, %v2637_v21 }
 0xf63   : > { %v1705_v46 = vpack.c.bf16 %v1704_v43, %v1704_v43  ;;  %v2607_v43 = vld [vmem:[%s3264_s11] sm:$0xff]  }
 0xf64   : > { %v1815_v50 = vpack.c.bf16 %v1814_v49, %v1814_v49 }
 0xf65   : > { %2490 = vmatmul.mubr.msk.bf16.vlgmr.msra.gmra.mxu1 %vm594_vm2, %v1705_v46 }
 0xf66   : > { %2500 = vmatpush3.bf16.msra.mxu1 %v1822_v48  ;;  %2501 = vmatprep.mubr.msk.bf16.mxu1 %vm2715_vm1, %v2714_v8 }
 0xf67   : > { %2513 = vmatprep.subr.bf16.mxu1 %v2714_v8 }
 0xf6d   : > { %2502 = vmatmul.mubr.msk.bf16.vlgmr.msra.gmra.mxu1 %vm594_vm2, %v1815_v50 }
 0xf6e   : > { %2517 = vmatprep.mubr.msk.bf16.mxu1 %vm2715_vm1, %v2714_v8  ;;  %2514 = vmatpush3.bf16.msra.mxu1 %v2602_v32 }
 0xf6f   : > { %2515 = vmatprep.subr.bf16.mxu1 %v2714_v8 }
 0xff0   : > { %v1528_v51 = vpop.f32.mrf.mxu1 }
 0xff2   : > { %v2467_v52 = vpop.f32.mrf.mxu1 }
 0xff4   : > { %v1531_v53 = vpop.f32.mrf.mxu1 }
 0xff6   : > { %v2468_v54 = vpop.f32.mrf.mxu1 }
 0xffe   : > { %v1638_v55 = vpop.f32.mrf.mxu1 }
 0xfff   : > { %1865 = vrot.lane.b32.xlu0 %v1638_v55, %s3308_s30 }
0x1000   : > { %v2479_v56 = vpop.f32.mrf.mxu1 }
0x1002   : > { %v1641_v57 = vpop.f32.mrf.mxu1 }
0x1004   : > { %v2480_v58 = vpop.f32.mrf.mxu1 }
0x1025   : > { %v1748_v61 = vpop.f32.mrf.mxu1 }
0x1026   : > { %1869 = vrot.lane.b32.xlu1 %v1748_v61, %s3309_s0  ;;  %s2302_s0 = sshll.u32 %s2832_s22, 7  ;;  %s2730_s22 = smov [#allocation2]  }
0x1027   : > { %v2491_v63 = vpop.f32.mrf.mxu1  ;;  %s2170_s17 = scalar_lea.hbm %s3268_s15, %s2302_s0 }
0x1029   : > { %v1751_v2 = vpop.f32.mrf.mxu1 }
0x102b   : > { %v2492_v4 = vpop.f32.mrf.mxu1 }
0x102d   : > { %v1858_v6 = vpop.f32.mrf.mxu1 }
0x102e   : > { %1873 = vrot.lane.b32.xlu0 %v1858_v6, %s3310_s2  ;;  %s485_s2 = scalar_lea.vmem [#allocation2], %s2235_s26  ;;  %s2656_s26 = sshll.u32 %s2730_s22, 4  ;;  %s2657_s26 = int_to_ptr.vmem [resolvable:$false] %s2656_s26 }
0x102f   : > { %v2503_v7 = vpop.f32.mrf.mxu1  ;;  %s2172_s25 = sshll.u32 %s485_s2, 4  ;;  %s2658_s4 = scalar_lea.vmem %s2657_s26, 256  ;;  %s2173_s25 = int_to_ptr.vmem [resolvable:$true] %s2172_s25 }
0x1030   : > { %s2652_s3 = scalar_lea.vmem %s2173_s25, 128  ;;  %p2659_p0 = scmp.lt.s32.totalorder %s2173_s25, %s2657_s26 }
0x1031   : > { %v1861_v9 = vpop.f32.mrf.mxu1  ;;  %p2653_p11 = scmp.ne.s32.totalorder %s2173_s25, %s2652_s3  ;;  %p2660_p1 = scmp.lt.s32.totalorder %s2658_s4, %s2652_s3 }
0x1033   : > { %v2504_v10 = vpop.f32.mrf.mxu1  ;;  %p2654_p12 = pnand %p2653_p11, %p2849_p5  ;;  %p2661_p2 = por %p2660_p1, %p2659_p0 }
0x1035   : > { %p2655_p13 = pneg %p2654_p12 }
0x1037   : > { %p2662_p3 = pnand %p2661_p2, %p2655_p13 }
0x1071   : > { %v1866_v11 = vpop.permute.xlu0 %1865 }
0x1072   : > { %v1876_v13 = vsel %vm594_vm2, %v1528_v51, %v1866_v11 }
0x1098   : > { %v1870_v12 = vpop.permute.xlu1 %1869 }
0x1099   : > { %v1877_v15 = vsel %vm1045_vm4, %v1876_v13, %v1870_v12 }
0x10a0   : > { %v1874_v17 = vpop.permute.xlu0 %1873 }
0x10a1   : > { %v1878_v18 = vsel %vm1047_vm5, %v1877_v15, %v1874_v17 }
0x10a2   : > { %v1879_v19 = vpack.c.bf16 %v1878_v18, %v1878_v18 }
0x10a4   : > { %2510 = vmatmul.mubr.msk.bf16.vlgmr.msra.gmra.mxu0 %vm494_vm0, %v1879_v19 }
0x10a5   : > { %2529 = vmatprep.mubr.msk.bf16.mxu0 %vm2715_vm1, %v2714_v8 }
0x1164   : > { %v1940_v21 = vpop.f32.mrf.mxu0 }
0x1165   : > { %v1941_v22 = vadd.f32 %v2998_v5, %v1940_v21  ;;  %v2603_v5 = vld [vmem:[%s3262_s9] sm:$0xff]  }
0x1166   : > { %v2511_v0 = vpop.f32.mrf.mxu0  ;;  %2516 = vmatpush3.bf16.msra.mxu1 %v2603_v5 }
0x1167   : > { %v1946_v23 = vadd.f32 %v1941_v22, %v3072_v3  ;;  %v2604_v3 = vld [vmem:[%s3264_s11 + $0x18] sm:$0xff]  }
0x1168   : > { %v1943_v25 = vpop.f32.mrf.mxu0  ;;  %2522 = vmatpush3.bf16.msra.mxu0 %v2604_v3 }
0x1169   : > { %v1949_v26 = vsel %vm494_vm0, %v1946_v23, 0.0  ;;  %2523 = vmatprep.subr.bf16.mxu0 %v2714_v8 }
0x116a   : > { %1950 = vadd.xlane.f32.xlu1 %v1949_v26  ;;  %v2512_v24 = vpop.f32.mrf.mxu0 }
0x116c   : > { %2524 = vmatpush3.bf16.msra.mxu0 %v2605_v33 }
0x116d   : > { %2525 = vmatprep.subr.bf16.mxu0 %v2714_v8 }
0x1170   : > { %2526 = vmatpush3.bf16.msra.mxu0 %v2606_v42 }
0x1171   : > { %2527 = vmatprep.subr.bf16.mxu0 %v2714_v8 }
0x1174   : > { %2528 = vmatpush3.bf16.msra.mxu0 %v2607_v43 }
0x11f3   : > { %v1951_v28 = vpop.xlane.xlu1 %1950 }
0x11f4   : > { %v1952_v14 = vmul.f32 0.03125, %v1951_v28 }
0x11f6   : > { %v1953_v16 = vsub.f32 %v1946_v23, %v1952_v14 }
0x11f8   : > { %v1954_v20 = vmul.f32 %v1953_v16, %v1953_v16 }
0x11fa   : > { %v1955_v30 = vsel %vm494_vm0, %v1954_v20, 0.0 }
0x11fb   : > { %1956 = vadd.xlane.f32.xlu0 %v1955_v30 }
0x1284   : > { %v1957_v27 = vpop.xlane.xlu0 %1956 }
0x1285   : > { %v1958_v34 = vmul.f32 0.03125, %v1957_v27 }
0x1287   : > { %v1959_v35 = vadd.f32 1e-06, %v1958_v34 }
0x1289   : > { %2648 = vrsqrt.f32 %v1959_v35 }
0x1296   : > { %v2649_v36 = vpop.eup %2648 }
0x1297   : > { %v1961_v38 = vmul.f32 %v2649_v36, %v1953_v16 }
0x1299   : > { %v1968_v39 = vmul.f32 %v3023_v29, %v1961_v38 }
0x129b   : > { %v1975_v40 = vadd.f32 %v3028_v31, %v1968_v39 }
0x129d   : > { %v1976_v41 = vpack.c.bf16 %v1975_v40, %v1975_v40 }
0x129f   : > { %2518 = vmatmul.mubr.msk.bf16.vlgmr.msra.gmra.mxu1 %vm494_vm0, %v1976_v41 }
0x135f   : > { %v2037_v44 = vpop.f32.mrf.mxu1 }
0x1360   : > { %v2038_v29 = vadd.f32 %v3046_v37, %v2037_v44 }
0x1361   : > { %v2519_v46 = vpop.f32.mrf.mxu1 }
0x1362   : > { %v2043_v31 = vmax.f32 %v2038_v29, 0.0 }
0x1363   : > { %v2040_v47 = vpop.f32.mrf.mxu1 }
0x1364   : > { %v2044_v48 = vpack.c.bf16 %v2043_v31, %v2043_v31 }
0x1365   : > { %v2520_v49 = vpop.f32.mrf.mxu1 }
0x1366   : > { %2530 = vmatmul.mubr.msk.bf16.vlgmr.msra.gmra.mxu0 %vm1254_vm6, %v2044_v48 }
0x1426   : > { %v2121_v50 = vpop.f32.mrf.mxu0 }
0x1427   : > { %v2122_v51 = vadd.f32 %v3055_v45, %v2121_v50 }
0x1428   : > { %v2531_v52 = vpop.f32.mrf.mxu0 }
0x1429   : > { %v2127_v8 = vadd.f32 %v2122_v51, %v1946_v23 }
0x142a   : > { %v2124_v53 = vpop.f32.mrf.mxu0 }
0x142b   : > { %v2130_v54 = vsel %vm494_vm0, %v2127_v8, 0.0 }
0x142c   : > { %2131 = vadd.xlane.f32.xlu0 %v2130_v54  ;;  %v2532_v55 = vpop.f32.mrf.mxu0 }
0x14b5   : > { %v2132_v37 = vpop.xlane.xlu0 %2131 }
0x14b6   : > { %v2133_v56 = vmul.f32 0.03125, %v2132_v37 }
0x14b8   : > { %v2134_v57 = vsub.f32 %v2127_v8, %v2133_v56 }
0x14ba   : > { %v2135_v58 = vmul.f32 %v2134_v57, %v2134_v57 }
0x14bc   : > { %v2136_v59 = vsel %vm494_vm0, %v2135_v58, 0.0 }
0x14bd   : > { %2137 = vadd.xlane.f32.xlu1 %v2136_v59 }
0x1546   : > { %v2138_v60 = vpop.xlane.xlu1 %2137 }
0x1547   : > { %v2139_v61 = vmul.f32 0.03125, %v2138_v60 }
0x1549   : > { %v2140_v63 = vadd.f32 1e-06, %v2139_v61 }
0x154b   : > { %2650 = vrsqrt.f32 %v2140_v63 }
0x1558   : > { %v2651_v45 = vpop.eup %2650 }
0x1559   : > { %v2142_v2 = vmul.f32 %v2651_v45, %v2134_v57 }
0x155b   : > { %v2149_v4 = vmul.f32 %v3063_v62, %v2142_v2 }
0x155d   : > { %v2156_v6 = vadd.f32 %v3068_v1, %v2149_v4 }
0x155f   : > { %2157 = vst.msk [vmem:[%s485_s2] sm:$0xff] %vm494_vm0, %v2156_v6 }
0x1560   : > { %2665 = shalt.err (!%p2662_p3)
}
0x1561   : > { %s2666_s30 = scalar_lea.hbm %s2170_s17, 128  ;;  %s2670_s2 = scalar_lea.hbm %s3268_s15, 256 }
0x1562   : > { %p2667_p4 = scmp.ne.s32.totalorder %s2170_s17, %s2666_s30  ;;  %p2671_p9 = scmp.lt.s32.totalorder %s2170_s17, %s3268_s15 }
0x1563   : > { %p2672_p10 = scmp.lt.s32.totalorder %s2670_s2, %s2666_s30 }
0x1564   : > { %p2668_p7 = pnand %p2667_p4, %p2849_p5 }
0x1565   : > { %p2673_p11 = por %p2672_p10, %p2671_p9 }
0x1566   : > { %p2669_p8 = pneg %p2668_p7 }
0x1568   : > { %p2674_p12 = pnand %p2673_p11, %p2669_p8 }
0x156a   : > { %2677 = shalt.err (!%p2674_p12)
}
0x156b   : > { %2533 = dma.vmem_to_hbm [thread:$0]  (%p2849_p5), %s2173_s25, 128, %s2170_s17, %s2159_s1  }
0x156c PF: > { %p2539_p13 = scmp.ge.s32.totalorder %s2712_s21, 2  ;;  %s2184_s3 = sand.u32 1, %s2700_s18  }
0x156d   : > { %s2185_s4 = scalar_lea.sflag [#allocation3], %s2184_s3 }
0x156e   : > { %p2536_p0 = pnand %p2539_p13, %p2853_p6 }
0x1570   : > { %p2537_p1 = pneg %p2536_p0 }
0x1572   : > { %2695 = dma.done.wait (%p2537_p1), %s2185_s4, 128  }
0x1573   : > { %2697 = vsyncadd (%p2537_p1), %s2185_s4, 4294967168  ;;  %p25_p2 = scmp.ge.s32.totalorder %s2836_s24, 4   ;;  %s3311_s18 = smov %s2704_s19 }
0x1574   : > { %s3312_s19 = smov %s2708_s20  ;;  %s3313_s20 = smov %s2847_s27 }
0x1575   : > { %s3314_s21 = smov %s2836_s24  ;;  %27 = sbr.rel (!%p25_p2) target bundleno = 10 (0xa), region = 115 }
0x157a   :  { %2190 = vsyncpa [#allocation3], 1 }
0x157b   :  { %2192 = vsyncpa [#allocation3 + $0x1], 1 }

</bundles_post_ra>
